<compile_context>
chip_gen: v7x
topology: tpu7x:2x2x1
jax: 0.10.0
libtpu: 0.0.40
codegen_flags: <defaults>
</compile_context>

<pallas_src>
import jax
import jax.numpy as jnp
from jax.experimental import pallas as pl
from jax.experimental.pallas import tpu as pltpu

NEG_PAD = -1e30  # bias for lane-padded logits: exp() underflows to exactly 0


def rnn_seq_kernel(x_ref, h0_ref, wx_ref, wh_ref, bxh_ref, woo_ref, boo_ref,
                   out_ref, hlast_ref, xz_ref):
    T, BB, I = x_ref.shape
    H = h0_ref.shape[1]

    # Hoist the input projection out of the recurrence: one big MXU matmul
    # over all T*BB rows for this batch block, results parked in VMEM scratch.
    x_flat = x_ref[...].reshape(T * BB, I)                      # (T*BB, I)
    xz_ref[...] = jnp.dot(x_flat, wx_ref[...],
                          preferred_element_type=jnp.float32)   # (T*BB, H+O)

    # Weights / biases stay resident in VMEM (and vregs) across all time steps.
    wh = wh_ref[...]            # (H, H+O)
    bxh = bxh_ref[...]          # (1, H+O)
    woo = woo_ref[...]          # (H+O, O_pad)
    boo = boo_ref[...]          # (1, O_pad)   (padded lanes hold NEG_PAD)

    def step(t, h):
        row = pl.multiple_of(t * BB, BB)
        xz_t = xz_ref[pl.ds(row, BB), :]                        # (BB, H+O)
        # Same add order as the PyTorch module: ((x@Wx) + (h@Wh)) + b
        z = (xz_t + jnp.dot(h, wh, preferred_element_type=jnp.float32)) + bxh
        out = jnp.dot(z, woo, preferred_element_type=jnp.float32) + boo
        # Dropout(p=0.1) -> identity in eval mode.
        # TODO(synk): training-mode dropout would need pltpu.prng_seed /
        #             pltpu.prng_random_bits and a 1/(1-p) scale.
        # LogSoftmax over lanes; padded lanes carry NEG_PAD so exp() -> 0 and
        # they never win the max — result in the first O lanes is exact.
        m = jnp.max(out, axis=1, keepdims=True)
        s = out - m
        lse = jnp.log(jnp.sum(jnp.exp(s), axis=1, keepdims=True))
        out_ref[t] = (s - lse).astype(out_ref.dtype)
        return z[:, :H]                                          # carried hidden

    h_final = jax.lax.fori_loop(0, T, step, h0_ref[...], unroll=True)
    hlast_ref[...] = h_final.astype(hlast_ref.dtype)             # written once


def rnn_forward_seq(x_seq, h0, fused, *, output_size, batch_block=None):
    """Run the RNN over a whole sequence in ONE pallas_call.

    x_seq : (T, B, input_size)
    h0    : (B, hidden_size)
    fused : (W_x, W_h, b_xh, W_o2o_padded, b_o2o_padded) -- see fuse_params
    batch_block : None -> single block (v5e/v6e); use B//2 on v7x (megacore).
    returns (log_probs (T, B, output_size), final_hidden (B, hidden_size))
    """
    wx, wh, bxh, woo_pad, boo_pad = fused
    T, B, I = x_seq.shape
    H = wh.shape[0]
    HO = wx.shape[1]
    O_pad = woo_pad.shape[1]

    BB = B if batch_block is None else int(batch_block)
    assert B % BB == 0
    assert BB == B or BB % 8 == 0, "batch block must be a multiple of 8 sublanes"

    grid = (B // BB,)   # batch blocks only; the time loop runs inside the kernel

    out_pad, h_last = pl.pallas_call(
        rnn_seq_kernel,
        out_shape=(
            jax.ShapeDtypeStruct((T, B, O_pad), jnp.float32),
            jax.ShapeDtypeStruct((B, H), jnp.float32),
        ),
        grid_spec=pltpu.PrefetchScalarGridSpec(
            num_scalar_prefetch=0,
            grid=grid,
            in_specs=[
                pl.BlockSpec((T, BB, I), lambda b: (0, b, 0)),   # whole sequence, one DMA
                pl.BlockSpec((BB, H), lambda b: (b, 0)),         # h0
                pl.BlockSpec((I, HO), lambda b: (0, 0)),         # W_x    (resident)
                pl.BlockSpec((H, HO), lambda b: (0, 0)),         # W_h    (resident, no zero rows)
                pl.BlockSpec((1, HO), lambda b: (0, 0)),         # b_xh   (resident)
                pl.BlockSpec((HO, O_pad), lambda b: (0, 0)),     # W_o2o  (lane-padded, resident)
                pl.BlockSpec((1, O_pad), lambda b: (0, 0)),      # b_o2o  (lane-padded, resident)
            ],
            out_specs=(
                pl.BlockSpec((T, BB, O_pad), lambda b: (0, b, 0)),  # lane-dense log-probs
                pl.BlockSpec((BB, H), lambda b: (b, 0)),            # final hidden
            ),
            scratch_shapes=[pltpu.VMEM((T * BB, HO), jnp.float32)],  # hoisted x @ W_x
        ),
        compiler_params=pltpu.CompilerParams(
            dimension_semantics=("parallel",)),   # one block/TC on v7x; no-op on v5e/v6e
    )(x_seq, h0, wx, wh, bxh, woo_pad, boo_pad)

    return out_pad[:, :, :output_size], h_last


def init_params(key, input_size, hidden_size, output_size):
    """Deterministic PyTorch-style Linear init: U(-1/sqrt(fan_in), 1/sqrt(fan_in))."""
    def linear(key, fan_in, fan_out):
        kw, kb = jax.random.split(key)
        bound = 1.0 / jnp.sqrt(jnp.float32(fan_in))
        # stored as (in_features, out_features)
        w = jax.random.uniform(kw, (fan_in, fan_out), jnp.float32, -bound, bound)
        b = jax.random.uniform(kb, (1, fan_out), jnp.float32, -bound, bound)
        return w, b

    k1, k2, k3 = jax.random.split(key, 3)
    w_i2h, b_i2h = linear(k1, input_size + hidden_size, hidden_size)
    w_i2o, b_i2o = linear(k2, input_size + hidden_size, output_size)
    w_o2o, b_o2o = linear(k3, hidden_size + output_size, output_size)

    wih_x, wih_h = w_i2h[:input_size], w_i2h[input_size:]
    wio_x, wio_h = w_i2o[:input_size], w_i2o[input_size:]
    woo_h, woo_o = w_o2o[:hidden_size], w_o2o[hidden_size:]
    return (wih_x, wih_h, b_i2h, wio_x, wio_h, b_i2o, woo_h, woo_o, b_o2o)


def fuse_params(params, input_size, hidden_size, output_size):
    """Fuse per-branch weights into the kernel's form; lane-pad the o2o output."""
    (wih_x, wih_h, bih, wio_x, wio_h, bio, woo_h, woo_o, boo) = params
    O = output_size
    O_pad = ((O + 127) // 128) * 128

    wx = jnp.concatenate([wih_x, wio_x], axis=1)    # (I, H+O)
    wh = jnp.concatenate([wih_h, wio_h], axis=1)    # (H, H+O)  -- no zero rows
    bxh = jnp.concatenate([bih, bio], axis=1)       # (1, H+O)
    woo = jnp.concatenate([woo_h, woo_o], axis=0)   # (H+O, O)
    woo_pad = jnp.pad(woo, ((0, 0), (0, O_pad - O)))                           # zero cols
    boo_pad = jnp.pad(boo, ((0, 0), (0, O_pad - O)), constant_values=NEG_PAD)  # -1e30 cols
    return (wx, wh, bxh, woo_pad, boo_pad)


def reference_forward_step(x, h, params):
    """Pure-JAX reference mirroring one PyTorch forward call (eval mode)."""
    (wih_x, wih_h, bih, wio_x, wio_h, bio, woo_h, woo_o, boo) = params
    hidden = x @ wih_x + h @ wih_h + bih
    output = x @ wio_x + h @ wio_h + bio
    out = hidden @ woo_h + output @ woo_o + boo
    out = jax.nn.log_softmax(out, axis=1)
    return out, hidden


def reference_forward_seq(x_seq, h0, params):
    h = h0
    outs = []
    for t in range(x_seq.shape[0]):
        o, h = reference_forward_step(x_seq[t], h, params)
        outs.append(o)
    return jnp.stack(outs, axis=0), h


if __name__ == "__main__":
    INPUT_SIZE = 16
    HIDDEN_SIZE = 32
    OUTPUT_SIZE = 16
    BATCH = 16     # multiple of 8 sublanes
    SEQ = 8

    key = jax.random.PRNGKey(0)
    kx, kp = jax.random.split(key, 2)

    x_seq = jax.random.normal(kx, (SEQ, BATCH, INPUT_SIZE), jnp.float32)
    h0 = jnp.zeros((BATCH, HIDDEN_SIZE), jnp.float32)   # initHidden broadcast to batch
    params = init_params(kp, INPUT_SIZE, HIDDEN_SIZE, OUTPUT_SIZE)
    fused = fuse_params(params, INPUT_SIZE, HIDDEN_SIZE, OUTPUT_SIZE)

    fwd = jax.jit(rnn_forward_seq, static_argnames=("output_size", "batch_block"))
    out_logp, new_hidden = fwd(x_seq, h0, fused, output_size=OUTPUT_SIZE)
    jax.block_until_ready((out_logp, new_hidden))

    ref_out, ref_hidden = reference_forward_seq(x_seq, h0, params)
    assert out_logp.shape == (SEQ, BATCH, OUTPUT_SIZE)
    assert new_hidden.shape == (BATCH, HIDDEN_SIZE)
    assert jnp.allclose(out_logp, ref_out, atol=1e-4, rtol=1e-4), \
        float(jnp.max(jnp.abs(out_logp - ref_out)))
    assert jnp.allclose(new_hidden, ref_hidden, atol=1e-4, rtol=1e-4), \
        float(jnp.max(jnp.abs(new_hidden - ref_hidden)))

    print("KERNEL_OK")
</pallas_src>

<mosaic_0001>
module attributes {stable_mosaic.version = 11 : i64} {
  func.func @rnn_seq_kernel(%arg0: i32, %arg1: memref<8x16x16xf32, #tpu.memory_space<vmem>>, %arg2: memref<16x32xf32, #tpu.memory_space<vmem>>, %arg3: memref<16x48xf32, #tpu.memory_space<vmem>>, %arg4: memref<32x48xf32, #tpu.memory_space<vmem>>, %arg5: memref<1x48xf32, #tpu.memory_space<vmem>>, %arg6: memref<48x128xf32, #tpu.memory_space<vmem>>, %arg7: memref<1x128xf32, #tpu.memory_space<vmem>>, %arg8: memref<8x16x128xf32, #tpu.memory_space<vmem>>, %arg9: memref<16x32xf32, #tpu.memory_space<vmem>>, %arg10: memref<128x48xf32, #tpu.memory_space<vmem>>) attributes {dimension_semantics = [#tpu.dimension_semantics<parallel>], iteration_bounds = array<i64: 1>, scalar_prefetch = 0 : i64, scratch_operands = 1 : i64, tpu.core_type = #tpu.core_type<tc>, window_params = [{transform_indices = @transform_0, window_bounds = array<i64: 8, 16, 16>}, {transform_indices = @transform_1, window_bounds = array<i64: 16, 32>}, {pipeline_mode = #tpu.pipeline_mode<synchronous>, transform_indices = @transform_2, window_bounds = array<i64: 16, 48>}, {pipeline_mode = #tpu.pipeline_mode<synchronous>, transform_indices = @transform_3, window_bounds = array<i64: 32, 48>}, {pipeline_mode = #tpu.pipeline_mode<synchronous>, transform_indices = @transform_4, window_bounds = array<i64: 1, 48>}, {pipeline_mode = #tpu.pipeline_mode<synchronous>, transform_indices = @transform_5, window_bounds = array<i64: 48, 128>}, {pipeline_mode = #tpu.pipeline_mode<synchronous>, transform_indices = @transform_6, window_bounds = array<i64: 1, 128>}, {transform_indices = @transform_7, window_bounds = array<i64: 8, 16, 128>}, {transform_indices = @transform_8, window_bounds = array<i64: 16, 32>}]} {
    %c0 = arith.constant 0 : index
    %c0_0 = arith.constant 0 : index
    %c0_1 = arith.constant 0 : index
    %0 = vector.load %arg1[%c0, %c0_0, %c0_1] : memref<8x16x16xf32, #tpu.memory_space<vmem>>, vector<8x16x16xf32>
    %1 = vector.shape_cast %0 : vector<8x16x16xf32> to vector<128x16xf32>
    %c0_2 = arith.constant 0 : index
    %c0_3 = arith.constant 0 : index
    %2 = vector.load %arg3[%c0_2, %c0_3] : memref<16x48xf32, #tpu.memory_space<vmem>>, vector<16x48xf32>
    %cst = arith.constant dense<0.000000e+00> : vector<128x48xf32>
    %3 = tpu.matmul %1, %2, %cst {dimension_numbers = #tpu.dot_dimension_numbers<[1], [0], [0], [1], [0, 0, 1, 1], [], []>} : vector<128x16xf32>, vector<16x48xf32>, vector<128x48xf32> -> vector<128x48xf32>
    %c0_4 = arith.constant 0 : index
    %c0_5 = arith.constant 0 : index
    %4 = vector.load %arg10[%c0_4, %c0_5] : memref<128x48xf32, #tpu.memory_space<vmem>>, vector<128x48xf32>
    tpu.vector_store %arg10[%c0_4, %c0_5], %3 {strides = array<i32>} : memref<128x48xf32, #tpu.memory_space<vmem>>, vector<128x48xf32>,
    %c0_6 = arith.constant 0 : index
    %c0_7 = arith.constant 0 : index
    %5 = vector.load %arg4[%c0_6, %c0_7] : memref<32x48xf32, #tpu.memory_space<vmem>>, vector<32x48xf32>
    %c0_8 = arith.constant 0 : index
    %c0_9 = arith.constant 0 : index
    %6 = vector.load %arg5[%c0_8, %c0_9] : memref<1x48xf32, #tpu.memory_space<vmem>>, vector<1x48xf32>
    %c0_10 = arith.constant 0 : index
    %c0_11 = arith.constant 0 : index
    %7 = vector.load %arg6[%c0_10, %c0_11] : memref<48x128xf32, #tpu.memory_space<vmem>>, vector<48x128xf32>
    %c0_12 = arith.constant 0 : index
    %c0_13 = arith.constant 0 : index
    %8 = vector.load %arg7[%c0_12, %c0_13] : memref<1x128xf32, #tpu.memory_space<vmem>>, vector<1x128xf32>
    %c0_14 = arith.constant 0 : index
    %c0_15 = arith.constant 0 : index
    %9 = vector.load %arg2[%c0_14, %c0_15] : memref<16x32xf32, #tpu.memory_space<vmem>>, vector<16x32xf32>
    %c0_i32 = arith.constant 0 : i32
    %c16_i32 = arith.constant 16 : i32
    %10 = arith.muli %c0_i32, %c16_i32 : i32
    %11 = tpu.assume_multiple %10, 16 : i32
    %12 = arith.index_cast %11 : i32 to index
    %c0_16 = arith.constant 0 : index
    %13 = vector.load %arg10[%12, %c0_16] : memref<128x48xf32, #tpu.memory_space<vmem>>, vector<16x48xf32>
    %cst_17 = arith.constant dense<0.000000e+00> : vector<16x48xf32>
    %14 = tpu.matmul %9, %5, %cst_17 {dimension_numbers = #tpu.dot_dimension_numbers<[1], [0], [0], [1], [0, 0, 1, 1], [], []>} : vector<16x32xf32>, vector<32x48xf32>, vector<16x48xf32> -> vector<16x48xf32>
    %15 = arith.addf %13, %14 : vector<16x48xf32>
    %16 = vector.broadcast %6 : vector<1x48xf32> to vector<16x48xf32>
    %17 = arith.addf %15, %16 : vector<16x48xf32>
    %cst_18 = arith.constant dense<0.000000e+00> : vector<16x128xf32>
    %18 = tpu.matmul %17, %7, %cst_18 {dimension_numbers = #tpu.dot_dimension_numbers<[1], [0], [0], [1], [0, 0, 1, 1], [], []>} : vector<16x48xf32>, vector<48x128xf32>, vector<16x128xf32> -> vector<16x128xf32>
    %19 = vector.broadcast %8 : vector<1x128xf32> to vector<16x128xf32>
    %20 = arith.addf %18, %19 : vector<16x128xf32>
    %cst_19 = arith.constant dense<0xFF800000> : vector<16xf32>
    %21 = vector.multi_reduction <maximumf>, %20, %cst_19 [1] : vector<16x128xf32> to vector<16xf32>
    %22 = vector.shape_cast %21 : vector<16xf32> to vector<16x1xf32>
    %23 = vector.broadcast %22 : vector<16x1xf32> to vector<16x128xf32>
    %24 = arith.subf %20, %23 : vector<16x128xf32>
    %25 = math.exp %24 : vector<16x128xf32>
    %cst_20 = arith.constant dense<0.000000e+00> : vector<16xf32>
    %26 = vector.multi_reduction <add>, %25, %cst_20 [1] : vector<16x128xf32> to vector<16xf32>
    %27 = vector.shape_cast %26 : vector<16xf32> to vector<16x1xf32>
    %28 = math.log %27 : vector<16x1xf32>
    %29 = vector.broadcast %28 : vector<16x1xf32> to vector<16x128xf32>
    %30 = arith.subf %24, %29 : vector<16x128xf32>
    %31 = arith.index_cast %c0_i32 : i32 to index
    %c0_21 = arith.constant 0 : index
    %c0_22 = arith.constant 0 : index
    %32 = vector.load %arg8[%31, %c0_21, %c0_22] : memref<8x16x128xf32, #tpu.memory_space<vmem>>, vector<1x16x128xf32>
    %33 = vector.shape_cast %32 : vector<1x16x128xf32> to vector<16x128xf32>
    %34 = vector.shape_cast %30 : vector<16x128xf32> to vector<1x16x128xf32>
    tpu.vector_store %arg8[%31, %c0_21, %c0_22], %34 {strides = array<i32>} : memref<8x16x128xf32, #tpu.memory_space<vmem>>, vector<1x16x128xf32>,
    %35 = vector.extract_strided_slice %17 {offsets = [0, 0], sizes = [16, 32], strides = [1, 1]} : vector<16x48xf32> to vector<16x32xf32>
    %c1_i32 = arith.constant 1 : i32
    %c16_i32_23 = arith.constant 16 : i32
    %36 = arith.muli %c1_i32, %c16_i32_23 : i32
    %37 = tpu.assume_multiple %36, 16 : i32
    %38 = arith.index_cast %37 : i32 to index
    %c0_24 = arith.constant 0 : index
    %39 = vector.load %arg10[%38, %c0_24] : memref<128x48xf32, #tpu.memory_space<vmem>>, vector<16x48xf32>
    %cst_25 = arith.constant dense<0.000000e+00> : vector<16x48xf32>
    %40 = tpu.matmul %35, %5, %cst_25 {dimension_numbers = #tpu.dot_dimension_numbers<[1], [0], [0], [1], [0, 0, 1, 1], [], []>} : vector<16x32xf32>, vector<32x48xf32>, vector<16x48xf32> -> vector<16x48xf32>
    %41 = arith.addf %39, %40 : vector<16x48xf32>
    %42 = vector.broadcast %6 : vector<1x48xf32> to vector<16x48xf32>
    %43 = arith.addf %41, %42 : vector<16x48xf32>
    %cst_26 = arith.constant dense<0.000000e+00> : vector<16x128xf32>
    %44 = tpu.matmul %43, %7, %cst_26 {dimension_numbers = #tpu.dot_dimension_numbers<[1], [0], [0], [1], [0, 0, 1, 1], [], []>} : vector<16x48xf32>, vector<48x128xf32>, vector<16x128xf32> -> vector<16x128xf32>
    %45 = vector.broadcast %8 : vector<1x128xf32> to vector<16x128xf32>
    %46 = arith.addf %44, %45 : vector<16x128xf32>
    %cst_27 = arith.constant dense<0xFF800000> : vector<16xf32>
    %47 = vector.multi_reduction <maximumf>, %46, %cst_27 [1] : vector<16x128xf32> to vector<16xf32>
    %48 = vector.shape_cast %47 : vector<16xf32> to vector<16x1xf32>
    %49 = vector.broadcast %48 : vector<16x1xf32> to vector<16x128xf32>
    %50 = arith.subf %46, %49 : vector<16x128xf32>
    %51 = math.exp %50 : vector<16x128xf32>
    %cst_28 = arith.constant dense<0.000000e+00> : vector<16xf32>
    %52 = vector.multi_reduction <add>, %51, %cst_28 [1] : vector<16x128xf32> to vector<16xf32>
    %53 = vector.shape_cast %52 : vector<16xf32> to vector<16x1xf32>
    %54 = math.log %53 : vector<16x1xf32>
    %55 = vector.broadcast %54 : vector<16x1xf32> to vector<16x128xf32>
    %56 = arith.subf %50, %55 : vector<16x128xf32>
    %57 = arith.index_cast %c1_i32 : i32 to index
    %c0_29 = arith.constant 0 : index
    %c0_30 = arith.constant 0 : index
    %58 = vector.load %arg8[%57, %c0_29, %c0_30] : memref<8x16x128xf32, #tpu.memory_space<vmem>>, vector<1x16x128xf32>
    %59 = vector.shape_cast %58 : vector<1x16x128xf32> to vector<16x128xf32>
    %60 = vector.shape_cast %56 : vector<16x128xf32> to vector<1x16x128xf32>
    tpu.vector_store %arg8[%57, %c0_29, %c0_30], %60 {strides = array<i32>} : memref<8x16x128xf32, #tpu.memory_space<vmem>>, vector<1x16x128xf32>,
    %61 = vector.extract_strided_slice %43 {offsets = [0, 0], sizes = [16, 32], strides = [1, 1]} : vector<16x48xf32> to vector<16x32xf32>
    %c2_i32 = arith.constant 2 : i32
    %c16_i32_31 = arith.constant 16 : i32
    %62 = arith.muli %c2_i32, %c16_i32_31 : i32
    %63 = tpu.assume_multiple %62, 16 : i32
    %64 = arith.index_cast %63 : i32 to index
    %c0_32 = arith.constant 0 : index
    %65 = vector.load %arg10[%64, %c0_32] : memref<128x48xf32, #tpu.memory_space<vmem>>, vector<16x48xf32>
    %cst_33 = arith.constant dense<0.000000e+00> : vector<16x48xf32>
    %66 = tpu.matmul %61, %5, %cst_33 {dimension_numbers = #tpu.dot_dimension_numbers<[1], [0], [0], [1], [0, 0, 1, 1], [], []>} : vector<16x32xf32>, vector<32x48xf32>, vector<16x48xf32> -> vector<16x48xf32>
    %67 = arith.addf %65, %66 : vector<16x48xf32>
    %68 = vector.broadcast %6 : vector<1x48xf32> to vector<16x48xf32>
    %69 = arith.addf %67, %68 : vector<16x48xf32>
    %cst_34 = arith.constant dense<0.000000e+00> : vector<16x128xf32>
    %70 = tpu.matmul %69, %7, %cst_34 {dimension_numbers = #tpu.dot_dimension_numbers<[1], [0], [0], [1], [0, 0, 1, 1], [], []>} : vector<16x48xf32>, vector<48x128xf32>, vector<16x128xf32> -> vector<16x128xf32>
    %71 = vector.broadcast %8 : vector<1x128xf32> to vector<16x128xf32>
    %72 = arith.addf %70, %71 : vector<16x128xf32>
    %cst_35 = arith.constant dense<0xFF800000> : vector<16xf32>
    %73 = vector.multi_reduction <maximumf>, %72, %cst_35 [1] : vector<16x128xf32> to vector<16xf32>
    %74 = vector.shape_cast %73 : vector<16xf32> to vector<16x1xf32>
    %75 = vector.broadcast %74 : vector<16x1xf32> to vector<16x128xf32>
    %76 = arith.subf %72, %75 : vector<16x128xf32>
    %77 = math.exp %76 : vector<16x128xf32>
    %cst_36 = arith.constant dense<0.000000e+00> : vector<16xf32>
    %78 = vector.multi_reduction <add>, %77, %cst_36 [1] : vector<16x128xf32> to vector<16xf32>
    %79 = vector.shape_cast %78 : vector<16xf32> to vector<16x1xf32>
    %80 = math.log %79 : vector<16x1xf32>
    %81 = vector.broadcast %80 : vector<16x1xf32> to vector<16x128xf32>
    %82 = arith.subf %76, %81 : vector<16x128xf32>
    %83 = arith.index_cast %c2_i32 : i32 to index
    %c0_37 = arith.constant 0 : index
    %c0_38 = arith.constant 0 : index
    %84 = vector.load %arg8[%83, %c0_37, %c0_38] : memref<8x16x128xf32, #tpu.memory_space<vmem>>, vector<1x16x128xf32>
    %85 = vector.shape_cast %84 : vector<1x16x128xf32> to vector<16x128xf32>
    %86 = vector.shape_cast %82 : vector<16x128xf32> to vector<1x16x128xf32>
    tpu.vector_store %arg8[%83, %c0_37, %c0_38], %86 {strides = array<i32>} : memref<8x16x128xf32, #tpu.memory_space<vmem>>, vector<1x16x128xf32>,
    %87 = vector.extract_strided_slice %69 {offsets = [0, 0], sizes = [16, 32], strides = [1, 1]} : vector<16x48xf32> to vector<16x32xf32>
    %c3_i32 = arith.constant 3 : i32
    %c16_i32_39 = arith.constant 16 : i32
    %88 = arith.muli %c3_i32, %c16_i32_39 : i32
    %89 = tpu.assume_multiple %88, 16 : i32
    %90 = arith.index_cast %89 : i32 to index
    %c0_40 = arith.constant 0 : index
    %91 = vector.load %arg10[%90, %c0_40] : memref<128x48xf32, #tpu.memory_space<vmem>>, vector<16x48xf32>
    %cst_41 = arith.constant dense<0.000000e+00> : vector<16x48xf32>
    %92 = tpu.matmul %87, %5, %cst_41 {dimension_numbers = #tpu.dot_dimension_numbers<[1], [0], [0], [1], [0, 0, 1, 1], [], []>} : vector<16x32xf32>, vector<32x48xf32>, vector<16x48xf32> -> vector<16x48xf32>
    %93 = arith.addf %91, %92 : vector<16x48xf32>
    %94 = vector.broadcast %6 : vector<1x48xf32> to vector<16x48xf32>
    %95 = arith.addf %93, %94 : vector<16x48xf32>
    %cst_42 = arith.constant dense<0.000000e+00> : vector<16x128xf32>
    %96 = tpu.matmul %95, %7, %cst_42 {dimension_numbers = #tpu.dot_dimension_numbers<[1], [0], [0], [1], [0, 0, 1, 1], [], []>} : vector<16x48xf32>, vector<48x128xf32>, vector<16x128xf32> -> vector<16x128xf32>
    %97 = vector.broadcast %8 : vector<1x128xf32> to vector<16x128xf32>
    %98 = arith.addf %96, %97 : vector<16x128xf32>
    %cst_43 = arith.constant dense<0xFF800000> : vector<16xf32>
    %99 = vector.multi_reduction <maximumf>, %98, %cst_43 [1] : vector<16x128xf32> to vector<16xf32>
    %100 = vector.shape_cast %99 : vector<16xf32> to vector<16x1xf32>
    %101 = vector.broadcast %100 : vector<16x1xf32> to vector<16x128xf32>
    %102 = arith.subf %98, %101 : vector<16x128xf32>
    %103 = math.exp %102 : vector<16x128xf32>
    %cst_44 = arith.constant dense<0.000000e+00> : vector<16xf32>
    %104 = vector.multi_reduction <add>, %103, %cst_44 [1] : vector<16x128xf32> to vector<16xf32>
    %105 = vector.shape_cast %104 : vector<16xf32> to vector<16x1xf32>
    %106 = math.log %105 : vector<16x1xf32>
    %107 = vector.broadcast %106 : vector<16x1xf32> to vector<16x128xf32>
    %108 = arith.subf %102, %107 : vector<16x128xf32>
    %109 = arith.index_cast %c3_i32 : i32 to index
    %c0_45 = arith.constant 0 : index
    %c0_46 = arith.constant 0 : index
    %110 = vector.load %arg8[%109, %c0_45, %c0_46] : memref<8x16x128xf32, #tpu.memory_space<vmem>>, vector<1x16x128xf32>
    %111 = vector.shape_cast %110 : vector<1x16x128xf32> to vector<16x128xf32>
    %112 = vector.shape_cast %108 : vector<16x128xf32> to vector<1x16x128xf32>
    tpu.vector_store %arg8[%109, %c0_45, %c0_46], %112 {strides = array<i32>} : memref<8x16x128xf32, #tpu.memory_space<vmem>>, vector<1x16x128xf32>,
    %113 = vector.extract_strided_slice %95 {offsets = [0, 0], sizes = [16, 32], strides = [1, 1]} : vector<16x48xf32> to vector<16x32xf32>
    %c4_i32 = arith.constant 4 : i32
    %c16_i32_47 = arith.constant 16 : i32
    %114 = arith.muli %c4_i32, %c16_i32_47 : i32
    %115 = tpu.assume_multiple %114, 16 : i32
    %116 = arith.index_cast %115 : i32 to index
    %c0_48 = arith.constant 0 : index
    %117 = vector.load %arg10[%116, %c0_48] : memref<128x48xf32, #tpu.memory_space<vmem>>, vector<16x48xf32>
    %cst_49 = arith.constant dense<0.000000e+00> : vector<16x48xf32>
    %118 = tpu.matmul %113, %5, %cst_49 {dimension_numbers = #tpu.dot_dimension_numbers<[1], [0], [0], [1], [0, 0, 1, 1], [], []>} : vector<16x32xf32>, vector<32x48xf32>, vector<16x48xf32> -> vector<16x48xf32>
    %119 = arith.addf %117, %118 : vector<16x48xf32>
    %120 = vector.broadcast %6 : vector<1x48xf32> to vector<16x48xf32>
    %121 = arith.addf %119, %120 : vector<16x48xf32>
    %cst_50 = arith.constant dense<0.000000e+00> : vector<16x128xf32>
    %122 = tpu.matmul %121, %7, %cst_50 {dimension_numbers = #tpu.dot_dimension_numbers<[1], [0], [0], [1], [0, 0, 1, 1], [], []>} : vector<16x48xf32>, vector<48x128xf32>, vector<16x128xf32> -> vector<16x128xf32>
    %123 = vector.broadcast %8 : vector<1x128xf32> to vector<16x128xf32>
    %124 = arith.addf %122, %123 : vector<16x128xf32>
    %cst_51 = arith.constant dense<0xFF800000> : vector<16xf32>
    %125 = vector.multi_reduction <maximumf>, %124, %cst_51 [1] : vector<16x128xf32> to vector<16xf32>
    %126 = vector.shape_cast %125 : vector<16xf32> to vector<16x1xf32>
    %127 = vector.broadcast %126 : vector<16x1xf32> to vector<16x128xf32>
    %128 = arith.subf %124, %127 : vector<16x128xf32>
    %129 = math.exp %128 : vector<16x128xf32>
    %cst_52 = arith.constant dense<0.000000e+00> : vector<16xf32>
    %130 = vector.multi_reduction <add>, %129, %cst_52 [1] : vector<16x128xf32> to vector<16xf32>
    %131 = vector.shape_cast %130 : vector<16xf32> to vector<16x1xf32>
    %132 = math.log %131 : vector<16x1xf32>
    %133 = vector.broadcast %132 : vector<16x1xf32> to vector<16x128xf32>
    %134 = arith.subf %128, %133 : vector<16x128xf32>
    %135 = arith.index_cast %c4_i32 : i32 to index
    %c0_53 = arith.constant 0 : index
    %c0_54 = arith.constant 0 : index
    %136 = vector.load %arg8[%135, %c0_53, %c0_54] : memref<8x16x128xf32, #tpu.memory_space<vmem>>, vector<1x16x128xf32>
    %137 = vector.shape_cast %136 : vector<1x16x128xf32> to vector<16x128xf32>
    %138 = vector.shape_cast %134 : vector<16x128xf32> to vector<1x16x128xf32>
    tpu.vector_store %arg8[%135, %c0_53, %c0_54], %138 {strides = array<i32>} : memref<8x16x128xf32, #tpu.memory_space<vmem>>, vector<1x16x128xf32>,
    %139 = vector.extract_strided_slice %121 {offsets = [0, 0], sizes = [16, 32], strides = [1, 1]} : vector<16x48xf32> to vector<16x32xf32>
    %c5_i32 = arith.constant 5 : i32
    %c16_i32_55 = arith.constant 16 : i32
    %140 = arith.muli %c5_i32, %c16_i32_55 : i32
    %141 = tpu.assume_multiple %140, 16 : i32
    %142 = arith.index_cast %141 : i32 to index
    %c0_56 = arith.constant 0 : index
    %143 = vector.load %arg10[%142, %c0_56] : memref<128x48xf32, #tpu.memory_space<vmem>>, vector<16x48xf32>
    %cst_57 = arith.constant dense<0.000000e+00> : vector<16x48xf32>
    %144 = tpu.matmul %139, %5, %cst_57 {dimension_numbers = #tpu.dot_dimension_numbers<[1], [0], [0], [1], [0, 0, 1, 1], [], []>} : vector<16x32xf32>, vector<32x48xf32>, vector<16x48xf32> -> vector<16x48xf32>
    %145 = arith.addf %143, %144 : vector<16x48xf32>
    %146 = vector.broadcast %6 : vector<1x48xf32> to vector<16x48xf32>
    %147 = arith.addf %145, %146 : vector<16x48xf32>
    %cst_58 = arith.constant dense<0.000000e+00> : vector<16x128xf32>
    %148 = tpu.matmul %147, %7, %cst_58 {dimension_numbers = #tpu.dot_dimension_numbers<[1], [0], [0], [1], [0, 0, 1, 1], [], []>} : vector<16x48xf32>, vector<48x128xf32>, vector<16x128xf32> -> vector<16x128xf32>
    %149 = vector.broadcast %8 : vector<1x128xf32> to vector<16x128xf32>
    %150 = arith.addf %148, %149 : vector<16x128xf32>
    %cst_59 = arith.constant dense<0xFF800000> : vector<16xf32>
    %151 = vector.multi_reduction <maximumf>, %150, %cst_59 [1] : vector<16x128xf32> to vector<16xf32>
    %152 = vector.shape_cast %151 : vector<16xf32> to vector<16x1xf32>
    %153 = vector.broadcast %152 : vector<16x1xf32> to vector<16x128xf32>
    %154 = arith.subf %150, %153 : vector<16x128xf32>
    %155 = math.exp %154 : vector<16x128xf32>
    %cst_60 = arith.constant dense<0.000000e+00> : vector<16xf32>
    %156 = vector.multi_reduction <add>, %155, %cst_60 [1] : vector<16x128xf32> to vector<16xf32>
    %157 = vector.shape_cast %156 : vector<16xf32> to vector<16x1xf32>
    %158 = math.log %157 : vector<16x1xf32>
    %159 = vector.broadcast %158 : vector<16x1xf32> to vector<16x128xf32>
    %160 = arith.subf %154, %159 : vector<16x128xf32>
    %161 = arith.index_cast %c5_i32 : i32 to index
    %c0_61 = arith.constant 0 : index
    %c0_62 = arith.constant 0 : index
    %162 = vector.load %arg8[%161, %c0_61, %c0_62] : memref<8x16x128xf32, #tpu.memory_space<vmem>>, vector<1x16x128xf32>
    %163 = vector.shape_cast %162 : vector<1x16x128xf32> to vector<16x128xf32>
    %164 = vector.shape_cast %160 : vector<16x128xf32> to vector<1x16x128xf32>
    tpu.vector_store %arg8[%161, %c0_61, %c0_62], %164 {strides = array<i32>} : memref<8x16x128xf32, #tpu.memory_space<vmem>>, vector<1x16x128xf32>,
    %165 = vector.extract_strided_slice %147 {offsets = [0, 0], sizes = [16, 32], strides = [1, 1]} : vector<16x48xf32> to vector<16x32xf32>
    %c6_i32 = arith.constant 6 : i32
    %c16_i32_63 = arith.constant 16 : i32
    %166 = arith.muli %c6_i32, %c16_i32_63 : i32
    %167 = tpu.assume_multiple %166, 16 : i32
    %168 = arith.index_cast %167 : i32 to index
    %c0_64 = arith.constant 0 : index
    %169 = vector.load %arg10[%168, %c0_64] : memref<128x48xf32, #tpu.memory_space<vmem>>, vector<16x48xf32>
    %cst_65 = arith.constant dense<0.000000e+00> : vector<16x48xf32>
    %170 = tpu.matmul %165, %5, %cst_65 {dimension_numbers = #tpu.dot_dimension_numbers<[1], [0], [0], [1], [0, 0, 1, 1], [], []>} : vector<16x32xf32>, vector<32x48xf32>, vector<16x48xf32> -> vector<16x48xf32>
    %171 = arith.addf %169, %170 : vector<16x48xf32>
    %172 = vector.broadcast %6 : vector<1x48xf32> to vector<16x48xf32>
    %173 = arith.addf %171, %172 : vector<16x48xf32>
    %cst_66 = arith.constant dense<0.000000e+00> : vector<16x128xf32>
    %174 = tpu.matmul %173, %7, %cst_66 {dimension_numbers = #tpu.dot_dimension_numbers<[1], [0], [0], [1], [0, 0, 1, 1], [], []>} : vector<16x48xf32>, vector<48x128xf32>, vector<16x128xf32> -> vector<16x128xf32>
    %175 = vector.broadcast %8 : vector<1x128xf32> to vector<16x128xf32>
    %176 = arith.addf %174, %175 : vector<16x128xf32>
    %cst_67 = arith.constant dense<0xFF800000> : vector<16xf32>
    %177 = vector.multi_reduction <maximumf>, %176, %cst_67 [1] : vector<16x128xf32> to vector<16xf32>
    %178 = vector.shape_cast %177 : vector<16xf32> to vector<16x1xf32>
    %179 = vector.broadcast %178 : vector<16x1xf32> to vector<16x128xf32>
    %180 = arith.subf %176, %179 : vector<16x128xf32>
    %181 = math.exp %180 : vector<16x128xf32>
    %cst_68 = arith.constant dense<0.000000e+00> : vector<16xf32>
    %182 = vector.multi_reduction <add>, %181, %cst_68 [1] : vector<16x128xf32> to vector<16xf32>
    %183 = vector.shape_cast %182 : vector<16xf32> to vector<16x1xf32>
    %184 = math.log %183 : vector<16x1xf32>
    %185 = vector.broadcast %184 : vector<16x1xf32> to vector<16x128xf32>
    %186 = arith.subf %180, %185 : vector<16x128xf32>
    %187 = arith.index_cast %c6_i32 : i32 to index
    %c0_69 = arith.constant 0 : index
    %c0_70 = arith.constant 0 : index
    %188 = vector.load %arg8[%187, %c0_69, %c0_70] : memref<8x16x128xf32, #tpu.memory_space<vmem>>, vector<1x16x128xf32>
    %189 = vector.shape_cast %188 : vector<1x16x128xf32> to vector<16x128xf32>
    %190 = vector.shape_cast %186 : vector<16x128xf32> to vector<1x16x128xf32>
    tpu.vector_store %arg8[%187, %c0_69, %c0_70], %190 {strides = array<i32>} : memref<8x16x128xf32, #tpu.memory_space<vmem>>, vector<1x16x128xf32>,
    %191 = vector.extract_strided_slice %173 {offsets = [0, 0], sizes = [16, 32], strides = [1, 1]} : vector<16x48xf32> to vector<16x32xf32>
    %c7_i32 = arith.constant 7 : i32
    %c16_i32_71 = arith.constant 16 : i32
    %192 = arith.muli %c7_i32, %c16_i32_71 : i32
    %193 = tpu.assume_multiple %192, 16 : i32
    %194 = arith.index_cast %193 : i32 to index
    %c0_72 = arith.constant 0 : index
    %195 = vector.load %arg10[%194, %c0_72] : memref<128x48xf32, #tpu.memory_space<vmem>>, vector<16x48xf32>
    %cst_73 = arith.constant dense<0.000000e+00> : vector<16x48xf32>
    %196 = tpu.matmul %191, %5, %cst_73 {dimension_numbers = #tpu.dot_dimension_numbers<[1], [0], [0], [1], [0, 0, 1, 1], [], []>} : vector<16x32xf32>, vector<32x48xf32>, vector<16x48xf32> -> vector<16x48xf32>
    %197 = arith.addf %195, %196 : vector<16x48xf32>
    %198 = vector.broadcast %6 : vector<1x48xf32> to vector<16x48xf32>
    %199 = arith.addf %197, %198 : vector<16x48xf32>
    %cst_74 = arith.constant dense<0.000000e+00> : vector<16x128xf32>
    %200 = tpu.matmul %199, %7, %cst_74 {dimension_numbers = #tpu.dot_dimension_numbers<[1], [0], [0], [1], [0, 0, 1, 1], [], []>} : vector<16x48xf32>, vector<48x128xf32>, vector<16x128xf32> -> vector<16x128xf32>
    %201 = vector.broadcast %8 : vector<1x128xf32> to vector<16x128xf32>
    %202 = arith.addf %200, %201 : vector<16x128xf32>
    %cst_75 = arith.constant dense<0xFF800000> : vector<16xf32>
    %203 = vector.multi_reduction <maximumf>, %202, %cst_75 [1] : vector<16x128xf32> to vector<16xf32>
    %204 = vector.shape_cast %203 : vector<16xf32> to vector<16x1xf32>
    %205 = vector.broadcast %204 : vector<16x1xf32> to vector<16x128xf32>
    %206 = arith.subf %202, %205 : vector<16x128xf32>
    %207 = math.exp %206 : vector<16x128xf32>
    %cst_76 = arith.constant dense<0.000000e+00> : vector<16xf32>
    %208 = vector.multi_reduction <add>, %207, %cst_76 [1] : vector<16x128xf32> to vector<16xf32>
    %209 = vector.shape_cast %208 : vector<16xf32> to vector<16x1xf32>
    %210 = math.log %209 : vector<16x1xf32>
    %211 = vector.broadcast %210 : vector<16x1xf32> to vector<16x128xf32>
    %212 = arith.subf %206, %211 : vector<16x128xf32>
    %213 = arith.index_cast %c7_i32 : i32 to index
    %c0_77 = arith.constant 0 : index
    %c0_78 = arith.constant 0 : index
    %214 = vector.load %arg8[%213, %c0_77, %c0_78] : memref<8x16x128xf32, #tpu.memory_space<vmem>>, vector<1x16x128xf32>
    %215 = vector.shape_cast %214 : vector<1x16x128xf32> to vector<16x128xf32>
    %216 = vector.shape_cast %212 : vector<16x128xf32> to vector<1x16x128xf32>
    tpu.vector_store %arg8[%213, %c0_77, %c0_78], %216 {strides = array<i32>} : memref<8x16x128xf32, #tpu.memory_space<vmem>>, vector<1x16x128xf32>,
    %217 = vector.extract_strided_slice %199 {offsets = [0, 0], sizes = [16, 32], strides = [1, 1]} : vector<16x48xf32> to vector<16x32xf32>
    %c8_i32 = arith.constant 8 : i32
    %c0_79 = arith.constant 0 : index
    %c0_80 = arith.constant 0 : index
    %218 = vector.load %arg9[%c0_79, %c0_80] : memref<16x32xf32, #tpu.memory_space<vmem>>, vector<16x32xf32>
    tpu.vector_store %arg9[%c0_79, %c0_80], %217 {strides = array<i32>} : memref<16x32xf32, #tpu.memory_space<vmem>>, vector<16x32xf32>,
    return
  }
  func.func @transform_0(%arg0: i32) -> (i32, i32, i32) {
    %c0_i32 = arith.constant 0 : i32
    %c0_i32_0 = arith.constant 0 : i32
    %c0_i32_1 = arith.constant 0 : i32
    return %c0_i32, %arg0, %c0_i32_0 : i32, i32, i32
  }
  func.func @transform_1(%arg0: i32) -> (i32, i32) {
    %c0_i32 = arith.constant 0 : i32
    %c0_i32_0 = arith.constant 0 : i32
    return %arg0, %c0_i32 : i32, i32
  }
  func.func @transform_2(%arg0: i32) -> (i32, i32) {
    %c0_i32 = arith.constant 0 : i32
    %c0_i32_0 = arith.constant 0 : i32
    %c0_i32_1 = arith.constant 0 : i32
    return %c0_i32, %c0_i32_0 : i32, i32
  }
  func.func @transform_3(%arg0: i32) -> (i32, i32) {
    %c0_i32 = arith.constant 0 : i32
    %c0_i32_0 = arith.constant 0 : i32
    %c0_i32_1 = arith.constant 0 : i32
    return %c0_i32, %c0_i32_0 : i32, i32
  }
  func.func @transform_4(%arg0: i32) -> (i32, i32) {
    %c0_i32 = arith.constant 0 : i32
    %c0_i32_0 = arith.constant 0 : i32
    %c0_i32_1 = arith.constant 0 : i32
    return %c0_i32, %c0_i32_0 : i32, i32
  }
  func.func @transform_5(%arg0: i32) -> (i32, i32) {
    %c0_i32 = arith.constant 0 : i32
    %c0_i32_0 = arith.constant 0 : i32
    %c0_i32_1 = arith.constant 0 : i32
    return %c0_i32, %c0_i32_0 : i32, i32
  }
  func.func @transform_6(%arg0: i32) -> (i32, i32) {
    %c0_i32 = arith.constant 0 : i32
    %c0_i32_0 = arith.constant 0 : i32
    %c0_i32_1 = arith.constant 0 : i32
    return %c0_i32, %c0_i32_0 : i32, i32
  }
  func.func @transform_7(%arg0: i32) -> (i32, i32, i32) {
    %c0_i32 = arith.constant 0 : i32
    %c0_i32_0 = arith.constant 0 : i32
    %c0_i32_1 = arith.constant 0 : i32
    return %c0_i32, %arg0, %c0_i32_0 : i32, i32, i32
  }
  func.func @transform_8(%arg0: i32) -> (i32, i32) {
    %c0_i32 = arith.constant 0 : i32
    %c0_i32_0 = arith.constant 0 : i32
    return %arg0, %c0_i32 : i32, i32
  }
}

</mosaic_0001>

<bundles_post_ra>
// kernel: rnn_forward_seq.1
= control target key start
LH: loop header
LB: loop body
LE: loop exit
PB: predicated region body
PF: predicated region fallthrough
CT: control target
= control target key end

     0   :  { %14 = vsyncpa [#allocation4], 0  ;;  %s3223_s0 = inlined_call_operand.hbm [shape: f32[8,16,16], index: 0, kind: input, shape index: {}]   ;;  %s3224_s1 = inlined_call_operand.hbm [shape: f32[16,32], index: 1, kind: input, shape index: {}]   ;;  %s3225_s2 = inlined_call_operand.hbm [shape: f32[16,48], index: 2, kind: input, shape index: {}]   ;;  %s3226_s3 = inlined_call_operand.hbm [shape: f32[32,48], index: 3, kind: input, shape index: {}]   ;;  %s3227_s4 = inlined_call_operand.vmem [shape: f32[1,48], index: 4, kind: input, shape index: {}]   ;;  %s3228_s5 = inlined_call_operand.hbm [shape: f32[48,128], index: 5, kind: input, shape index: {}]   ;;  %s3229_s6 = inlined_call_operand.vmem [shape: f32[1,128], index: 6, kind: input, shape index: {}]   ;;  %s3230_s7 = inlined_call_operand.hbm [shape: f32[8,16,128], index: 7, kind: output, shape index: {0}]   ;;  %s3231_s8 = inlined_call_operand.hbm [shape: f32[16,32], index: 8, kind: output, shape index: {1}]  }
   0x1   :  { %15 = vsyncpa [#allocation7], 0 }
   0x2   :  { %16 = vsyncpa [#allocation10], 0 }
   0x3   :  { %17 = vsyncpa [#allocation5], 0 }
   0x4   :  { %18 = vsyncpa [#allocation14], 0  ;;  %s2728_s27 = smov [#allocation6]   ;;  %s2729_s29 = smov [#allocation9]  }
   0x5   :  { %s36_s28 = sshll.u32 %s2728_s27, 4  ;;  %s60_s30 = sshll.u32 %s2729_s29, 4  ;;  %s37_s28 = int_to_ptr.vmem [resolvable:$true] %s36_s28  ;;  %s2782_s30 = int_to_ptr.vmem [resolvable:$true] %s60_s30 }
   0x6   :  { %s2564_s11 = scalar_lea.hbm %s3224_s1, 256 }
   0x7   :  { %p2565_p0 = scmp.ne.s32.totalorder %s3224_s1, %s2564_s11  ;;  %p2568_p1 = scmp.lt.u32.totalorder %s2564_s11, %s3224_s1 }
   0x9   :  { %p2570_p2 = pnand %p2568_p1, %p2565_p0 }
   0xb   :  { %2573 = shalt.err (!%p2570_p2)
}
   0xc   :  { %s2574_s16 = scalar_lea.vmem %s37_s28, 256  ;;  %p2579_p4 = scmp.lt.s32.totalorder %s37_s28, %s37_s28 }
   0xd   :  { %p2575_p3 = scmp.ne.s32.totalorder %s37_s28, %s2574_s16  ;;  %p2580_p5 = scmp.lt.s32.totalorder %s2574_s16, %s2574_s16 }
   0xf   :  { %p2581_p6 = por %p2580_p5, %p2579_p4 }
  0x11   :  { %p2582_p7 = pnand %p2581_p6, %p2575_p3 }
  0x13   :  { %2585 = shalt.err (!%p2582_p7)
}
  0x14   :  { %s2730_s17 = smov 128   ;;  %s2731_s18 = smov 8  }
  0x15   :  { %42 = dma.hbm_to_vmem [thread:$0]  %s3224_s1, 256, %s37_s28, [#allocation7], %s2730_s17, %s2730_s17, %s2731_s18  }
  0x16   :  { %s2586_s23 = scalar_lea.hbm %s3226_s3, 512 }
  0x17   :  { %p2587_p8 = scmp.ne.s32.totalorder %s3226_s3, %s2586_s23  ;;  %p2590_p9 = scmp.lt.u32.totalorder %s2586_s23, %s3226_s3 }
  0x19   :  { %p2592_p10 = pnand %p2590_p9, %p2587_p8 }
  0x1b   :  { %2595 = shalt.err (!%p2592_p10)
}
  0x1c   :  { %s2596_s29 = scalar_lea.vmem %s2782_s30, 512  ;;  %p2601_p12 = scmp.lt.s32.totalorder %s2782_s30, %s2782_s30 }
  0x1d   :  { %p2597_p11 = scmp.ne.s32.totalorder %s2782_s30, %s2596_s29  ;;  %p2602_p13 = scmp.lt.s32.totalorder %s2596_s29, %s2596_s29 }
  0x1f   :  { %p2603_p0 = por %p2602_p13, %p2601_p12 }
  0x21   :  { %p2604_p1 = pnand %p2603_p0, %p2597_p11 }
  0x23   :  { %2607 = shalt.err (!%p2604_p1)
}
  0x24   :  { %66 = dma.hbm_to_vmem [thread:$0]  %s3226_s3, 512, %s2782_s30, [#allocation10], %s2730_s17, %s2730_s17, %s2731_s18  }
  0x25   :  { %s2732_s9 = smov [#allocation3]   ;;  %s2733_s11 = smov [#allocation8]  }
  0x26   :  { %s24_s10 = sshll.u32 %s2732_s9, 4  ;;  %s48_s12 = sshll.u32 %s2733_s11, 4  ;;  %s25_s10 = int_to_ptr.vmem [resolvable:$true] %s24_s10  ;;  %s2819_s12 = int_to_ptr.vmem [resolvable:$true] %s48_s12 }
  0x27   :  { %s2608_s15 = scalar_lea.hbm %s3223_s0, 2048 }
  0x28   :  { %p2609_p2 = scmp.ne.s32.totalorder %s3223_s0, %s2608_s15  ;;  %p2612_p3 = scmp.lt.u32.totalorder %s2608_s15, %s3223_s0 }
  0x2a   :  { %p2614_p4 = pnand %p2612_p3, %p2609_p2 }
  0x2c   :  { %2617 = shalt.err (!%p2614_p4)
}
  0x2d   :  { %s2618_s3 = scalar_lea.vmem %s25_s10, 2048  ;;  %p2623_p6 = scmp.lt.s32.totalorder %s25_s10, %s25_s10 }
  0x2e   :  { %p2619_p5 = scmp.ne.s32.totalorder %s25_s10, %s2618_s3  ;;  %p2624_p7 = scmp.lt.s32.totalorder %s2618_s3, %s2618_s3 }
  0x30   :  { %p2625_p8 = por %p2624_p7, %p2623_p6 }
  0x32   :  { %p2626_p9 = pnand %p2625_p8, %p2619_p5 }
  0x34   :  { %2629 = shalt.err (!%p2626_p9)
}
  0x35   :  { %30 = dma.hbm_to_vmem [thread:$0]  %s3223_s0, 2048, %s25_s10, [#allocation4], %s2730_s17, %s2730_s17, %s2731_s18  }
  0x36   :  { %s2630_s25 = scalar_lea.hbm %s3225_s2, 256 }
  0x37   :  { %p2631_p10 = scmp.ne.s32.totalorder %s3225_s2, %s2630_s25  ;;  %p2634_p11 = scmp.lt.u32.totalorder %s2630_s25, %s3225_s2 }
  0x39   :  { %p2636_p12 = pnand %p2634_p11, %p2631_p10 }
  0x3b   :  { %2639 = shalt.err (!%p2636_p12)
}
  0x3c   :  { %s2640_s28 = scalar_lea.vmem %s2819_s12, 256  ;;  %p2645_p0 = scmp.lt.s32.totalorder %s2819_s12, %s2819_s12 }
  0x3d   :  { %p2641_p13 = scmp.ne.s32.totalorder %s2819_s12, %s2640_s28  ;;  %p2646_p1 = scmp.lt.s32.totalorder %s2640_s28, %s2640_s28 }
  0x3f   :  { %p2647_p2 = por %p2646_p1, %p2645_p0 }
  0x41   :  { %p2648_p3 = pnand %p2647_p2, %p2641_p13 }
  0x43   :  { %2651 = shalt.err (!%p2648_p3)
}
  0x44   :  { %54 = dma.hbm_to_vmem [thread:$0]  %s3225_s2, 256, %s2819_s12, [#allocation7], %s2730_s17, %s2730_s17, %s2731_s18  }
  0x45   :  { %s2734_s10 = smov [#allocation11]   ;;  %s2652_s15 = scalar_lea.hbm %s3228_s5, 768 }
  0x46   :  { %s74_s11 = sshll.u32 %s2734_s10, 4  ;;  %p2653_p4 = scmp.ne.s32.totalorder %s3228_s5, %s2652_s15  ;;  %s75_s11 = int_to_ptr.vmem [resolvable:$true] %s74_s11 }
  0x47   :  { %p2656_p5 = scmp.lt.u32.totalorder %s2652_s15, %s3228_s5 }
  0x49   :  { %p2658_p6 = pnand %p2656_p5, %p2653_p4 }
  0x4b   :  { %2661 = shalt.err (!%p2658_p6)
}
  0x4c   :  { %s2662_s3 = scalar_lea.vmem %s75_s11, 768  ;;  %p2667_p8 = scmp.lt.s32.totalorder %s75_s11, %s75_s11 }
  0x4d   :  { %p2663_p7 = scmp.ne.s32.totalorder %s75_s11, %s2662_s3  ;;  %p2668_p9 = scmp.lt.s32.totalorder %s2662_s3, %s2662_s3 }
  0x4f   :  { %p2669_p10 = por %p2668_p9, %p2667_p8 }
  0x51   :  { %p2670_p11 = pnand %p2669_p10, %p2663_p7 }
  0x53   :  { %2673 = shalt.err (!%p2670_p11)
}
  0x54   :  { %80 = dma.hbm_to_vmem [thread:$0]  %s3228_s5, 768, %s75_s11, [#allocation10], %s2730_s17, %s2730_s17, %s2731_s18  }
  0x55   :  { %2718 = dma.done.wait [#allocation4], 2048  }
  0x56   :  { %2719 = vsyncadd [#allocation4], 4294965248 }
  0x57   :  { %2720 = dma.done.wait [#allocation7], 512  }
  0x58   :  { %2721 = vsyncadd [#allocation7], 4294966784 }
  0x59   :  { %2722 = dma.done.wait [#allocation10], 1280  }
  0x5a   :  { %2723 = vsyncadd [#allocation10], 4294966016  ;;  %vm116_vm0 = vcmask 130048   ;;  %v114_v0 = vld [vmem:[#allocation8] sm:$0xff]  ;;  %v115_v1 = vld [vmem:[#allocation8 + $0x8] sm:$0xff]  ;;  %vm343_vm1 = vcmask 261120  }
  0x5b   :  { %v98_v2 = vld [vmem:[#allocation3] sm:$0xff]  ;;  %v2327_v3 = vpack.c.bf16 %v115_v1, %v114_v0  ;;  %v328_v5 = vld [vmem:[#allocation9 + $0x8] sm:$0xff]  ;;  %v329_v7 = vld [vmem:[#allocation9 + $0x10] sm:$0xff]  ;;  %vm310_vm2 = vcmask 392192  }
  0x5c   :  { %2095 = vmatprep.mubr.msk.f32.mxu0 %vm116_vm0, %v98_v2  ;;  %v327_v4 = vld [vmem:[#allocation9] sm:$0xff]  ;;  %v330_v8 = vld [vmem:[#allocation9 + $0x18] sm:$0xff]  ;;  %v99_v11 = vld [vmem:[#allocation3 + $0x8] sm:$0xff] }
  0x5d   :  { %v2872_v6 = vpack.c.bf16 %v328_v5, %v327_v4  ;;  %v339_v9 = vld [vmem:[#allocation6] sm:$0xff]  ;;  %2328 = vmatprep.subr.bf16.mxu0 %v2327_v3  ;;  %v2874_v10 = vpack.c.bf16 %v330_v8, %v329_v7  ;;  %v340_v12 = vld [vmem:[#allocation6 + $0x8] sm:$0xff]  ;;  %v334_v16 = vld [vmem:[#allocation11 + $0x10] sm:$0xff] }
  0x5e   :  { %2127 = vmatprep.mubr.msk.f32.mxu1 %vm343_vm1, %v339_v9  ;;  %2330 = vmatpush3.bf16.msra.mxu0 %v2327_v3  ;;  %v332_v13 = vld [vmem:[#allocation11] sm:$0xff]  ;;  %v333_v14 = vld [vmem:[#allocation11 + $0x8] sm:$0xff]  ;;  %v335_v17 = vld [vmem:[#allocation11 + $0x18] sm:$0xff] }
  0x5f   :  { %2332 = vmatprep.subr.bf16.mxu1 %v2872_v6  ;;  %v2883_v15 = vpack.c.bf16 %v333_v14, %v332_v13  ;;  %v2888_v18 = vpack.c.bf16 %v335_v17, %v334_v16  ;;  %v336_v19 = vld [vmem:[#allocation11 + $0x20] sm:$0xff]  ;;  %v337_v20 = vld [vmem:[#allocation11 + $0x28] sm:$0xff]  ;;  %v100_v22 = vld [vmem:[#allocation3 + $0x10] sm:$0xff] }
  0x60   :  { %2334 = vmatpush3.bf16.msra.mxu1 %v2872_v6  ;;  %v2895_v21 = vpack.c.bf16 %v337_v20, %v336_v19  ;;  %v101_v23 = vld [vmem:[#allocation3 + $0x18] sm:$0xff]  ;;  %v102_v24 = vld [vmem:[#allocation3 + $0x20] sm:$0xff]  ;;  %v103_v25 = vld [vmem:[#allocation3 + $0x28] sm:$0xff] }
  0x61   :  { %2336 = vmatprep.subr.bf16.mxu1 %v2874_v10  ;;  %2096 = vmatmul.mubr.msk.f32.vlgmr.msra.gmra.mrb[0].mxu0 %vm116_vm0, %v99_v11  ;;  %v104_v26 = vld [vmem:[#allocation3 + $0x30] sm:$0xff]  ;;  %v105_v27 = vld [vmem:[#allocation3 + $0x38] sm:$0xff]  ;;  %v106_v28 = vld [vmem:[#allocation3 + $0x40] sm:$0xff] }
  0x62   :  { %2360 = vmatprep.subr.bf16.mxu0 %v2883_v15  ;;  %2098 = vmatprep.mubr.msk.f32.mxu0 %vm116_vm0, %v100_v22  ;;  %v107_v29 = vld [vmem:[#allocation3 + $0x48] sm:$0xff]  ;;  %v2916_v35 = vld [vmem:[%s3227_s4] ss:$0 sm:$0xff]  ;;  %v108_v43 = vld [vmem:[#allocation3 + $0x50] sm:$0xff] }
  0x63   :  { %2362 = vmatpush3.bf16.msra.mxu0 %v2883_v15  ;;  %v109_v44 = vld [vmem:[#allocation3 + $0x58] sm:$0xff]  ;;  %v110_v45 = vld [vmem:[#allocation3 + $0x60] sm:$0xff]  ;;  %v111_v46 = vld [vmem:[#allocation3 + $0x68] sm:$0xff] }
  0x64   :  { %2338 = vmatpush3.bf16.msra.mxu1 %v2874_v10  ;;  %2364 = vmatprep.subr.bf16.mxu0 %v2888_v18  ;;  %v112_v47 = vld [vmem:[#allocation3 + $0x70] sm:$0xff]  ;;  %v113_v48 = vld [vmem:[#allocation3 + $0x78] sm:$0xff]  ;;  %v2943_v49 = vld [vmem:[%s3229_s6] ss:$0 sm:$0xff]  ;;  %s2735_s6 = smov [#allocation13]  }
  0x65   :  { %2340 = vmatprep.subr.bf16.mxu1 %v2883_v15  ;;  %2099 = vmatmul.mubr.msk.f32.gmra.mrb[2].mxu0 %vm116_vm0, %v101_v23  ;;  %s1893_s23 = sshll.u32 %s2735_s6, 4  ;;  %s1894_s23 = int_to_ptr.vmem [resolvable:$true] %s1893_s23 }
  0x66   :  { %2101 = vmatprep.mubr.msk.f32.mxu0 %vm116_vm0, %v102_v24  ;;  %s2674_s24 = scalar_lea.vmem %s1894_s23, 256  ;;  %p2679_p13 = scmp.lt.s32.totalorder %s1894_s23, %s1894_s23 }
  0x67   :  { %2128 = vmatmul.mubr.msk.f32.vlgmr.msra.gmra.mrb[0].mxu1 %vm343_vm1, %v340_v12  ;;  %2366 = vmatpush3.bf16.msra.mxu0 %v2888_v18  ;;  %p2675_p12 = scmp.ne.s32.totalorder %s1894_s23, %s2674_s24  ;;  %p2680_p0 = scmp.lt.s32.totalorder %s2674_s24, %s2674_s24 }
  0x68   :  { %2342 = vmatpush3.bf16.msra.mxu1 %v2883_v15  ;;  %2368 = vmatprep.subr.bf16.mxu0 %v2895_v21 }
  0x69   :  { %2344 = vmatprep.subr.bf16.mxu1 %v2888_v18  ;;  %2102 = vmatmul.mubr.msk.f32.gmra.mrb[4].mxu0 %vm116_vm0, %v103_v25  ;;  %p2681_p1 = por %p2680_p0, %p2679_p13 }
  0x6a   :  { %2104 = vmatprep.mubr.msk.f32.mxu0 %vm116_vm0, %v104_v26 }
  0x6b   :  { %2370 = vmatpush3.bf16.msra.mxu0 %v2895_v21  ;;  %p2682_p2 = pnand %p2681_p1, %p2675_p12 }
  0x6c   :  { %2346 = vmatpush3.bf16.msra.mxu1 %v2888_v18  ;;  %2380 = vmatprep.subr.bf16.mxu0 %v2883_v15 }
  0x6d   :  { %2348 = vmatprep.subr.bf16.mxu1 %v2895_v21  ;;  %2105 = vmatmul.mubr.msk.f32.gmra.mrb[6].mxu0 %vm116_vm0, %v105_v27 }
  0x6e   :  { %2107 = vmatprep.mubr.msk.f32.mxu0 %vm116_vm0, %v106_v28 }
  0x70   :  { %2350 = vmatpush3.bf16.msra.mxu1 %v2895_v21 }
  0x71   :  { %2352 = vmatprep.subr.bf16.mxu1 %v2872_v6  ;;  %2108 = vmatmul.mubr.msk.f32.gmra.mrb[8].mxu0 %vm116_vm0, %v107_v29 }
  0x72   :  { %2110 = vmatprep.mubr.msk.f32.mxu0 %vm116_vm0, %v108_v43 }
  0x75   :  { %2111 = vmatmul.mubr.msk.f32.gmra.mrb[10].mxu0 %vm116_vm0, %v109_v44 }
  0x76   :  { %2113 = vmatprep.mubr.msk.f32.mxu0 %vm116_vm0, %v110_v45 }
  0x79   :  { %2114 = vmatmul.mubr.msk.f32.gmra.mrb[12].mxu0 %vm116_vm0, %v111_v46 }
  0x7a   :  { %2116 = vmatprep.mubr.msk.f32.mxu0 %vm116_vm0, %v112_v47 }
  0x7d   :  { %2117 = vmatmul.mubr.msk.f32.gmra.mrb[14].mxu0 %vm116_vm0, %v113_v48 }
 0x134   :  { %v2097_v30 = vpop.f32.mrb[0].mxu0 }
 0x135   :  { %312 = vst.msk [vmem:[#allocation2 + $0x8] sm:$0xff] %vm310_vm2, %v2097_v30  ;;  %v231_v31 = vpop.f32.mrb[1].mxu0 }
 0x136   :  { %311 = vst.msk [vmem:[#allocation2] sm:$0xff] %vm310_vm2, %v231_v31 }
 0x138   :  { %v2100_v41 = vpop.f32.mrb[2].mxu0 }
 0x139   :  { %314 = vst.msk [vmem:[#allocation2 + $0x18] sm:$0xff] %vm310_vm2, %v2100_v41  ;;  %v241_v42 = vpop.f32.mrb[3].mxu0 }
 0x13a   :  { %v2129_v32 = vpop.f32.mrb[0].mxu1  ;;  %313 = vst.msk [vmem:[#allocation2 + $0x10] sm:$0xff] %vm310_vm2, %v241_v42 }
 0x13b   :  { %v416_v33 = vpop.f32.mrb[1].mxu1 }
 0x13c   :  { %v342_v34 = vld [vmem:[#allocation2 + $0x8] sm:$0xff]  ;;  %v2103_v62 = vpop.f32.mrb[4].mxu0 }
 0x13d   :  { %v426_v36 = vadd.f32 %v2129_v32, %v342_v34  ;;  %v341_v37 = vld [vmem:[#allocation2] sm:$0xff]  ;;  %316 = vst.msk [vmem:[#allocation2 + $0x28] sm:$0xff] %vm310_vm2, %v2103_v62  ;;  %v251_v63 = vpop.f32.mrb[5].mxu0 }
 0x13e   :  { %v425_v38 = vadd.f32 %v416_v33, %v341_v37  ;;  %315 = vst.msk [vmem:[#allocation2 + $0x20] sm:$0xff] %vm310_vm2, %v251_v63 }
 0x13f   :  { %v434_v40 = vadd.f32 %v2916_v35, %v426_v36 }
 0x140   :  { %v433_v39 = vadd.f32 %v2916_v35, %v425_v38  ;;  %v546_v54 = vld [vmem:[#allocation2 + $0x18] sm:$0xff]  ;;  %v2106_v0 = vpop.f32.mrb[6].mxu0 }
 0x141   :  { %v545_v55 = vld [vmem:[#allocation2 + $0x10] sm:$0xff]  ;;  %318 = vst.msk [vmem:[#allocation2 + $0x38] sm:$0xff] %vm310_vm2, %v2106_v0  ;;  %v261_v1 = vpop.f32.mrb[7].mxu0 }
 0x142   :  { %2142 = vmatprep.mubr.msk.f32.mxu1 %vm310_vm2, %v433_v39  ;;  %317 = vst.msk [vmem:[#allocation2 + $0x30] sm:$0xff] %vm310_vm2, %v261_v1 }
 0x143   :  { %2143 = vmatmul.mubr.msk.f32.vlgmr.msra.gmra.mrb[2].mxu1 %vm310_vm2, %v434_v40 }
 0x144   :  { %2354 = vmatpush3.bf16.msra.mxu1 %v2872_v6  ;;  %2153 = vmatprep.mubr.msk.f32.mxu1 %vm343_vm1, %v433_v39  ;;  %v2109_v2 = vpop.f32.mrb[8].mxu0  ;;  %v736_v12 = vld [vmem:[#allocation2 + $0x28] sm:$0xff] }
 0x145   :  { %2356 = vmatprep.subr.bf16.mxu1 %v2874_v10  ;;  %320 = vst.msk [vmem:[#allocation2 + $0x48] sm:$0xff] %vm310_vm2, %v2109_v2  ;;  %v271_v3 = vpop.f32.mrb[9].mxu0  ;;  %v735_v13 = vld [vmem:[#allocation2 + $0x20] sm:$0xff] }
 0x146   :  { %319 = vst.msk [vmem:[#allocation2 + $0x40] sm:$0xff] %vm310_vm2, %v271_v3 }
 0x148   :  { %2358 = vmatpush3.bf16.msra.mxu1 %v2874_v10  ;;  %v2112_v4 = vpop.f32.mrb[10].mxu0  ;;  %v926_v27 = vld [vmem:[#allocation2 + $0x38] sm:$0xff] }
 0x149   :  { %2372 = vmatprep.subr.bf16.mxu1 %v2872_v6  ;;  %322 = vst.msk [vmem:[#allocation2 + $0x58] sm:$0xff] %vm310_vm2, %v2112_v4  ;;  %v281_v5 = vpop.f32.mrb[11].mxu0  ;;  %v925_v28 = vld [vmem:[#allocation2 + $0x30] sm:$0xff] }
 0x14a   :  { %321 = vst.msk [vmem:[#allocation2 + $0x50] sm:$0xff] %vm310_vm2, %v281_v5 }
 0x14b   :  { %2154 = vmatmul.mubr.msk.f32.vlgmr.msra.gmra.mrb[4].mxu1 %vm343_vm1, %v434_v40 }
 0x14c   :  { %2374 = vmatpush3.bf16.msra.mxu1 %v2872_v6  ;;  %v2115_v7 = vpop.f32.mrb[12].mxu0  ;;  %v1116_v41 = vld [vmem:[#allocation2 + $0x48] sm:$0xff] }
 0x14d   :  { %2376 = vmatprep.subr.bf16.mxu1 %v2874_v10  ;;  %324 = vst.msk [vmem:[#allocation2 + $0x68] sm:$0xff] %vm310_vm2, %v2115_v7  ;;  %v291_v8 = vpop.f32.mrb[13].mxu0  ;;  %v1115_v46 = vld [vmem:[#allocation2 + $0x40] sm:$0xff] }
 0x14e   :  { %323 = vst.msk [vmem:[#allocation2 + $0x60] sm:$0xff] %vm310_vm2, %v291_v8 }
 0x150   :  { %2378 = vmatpush3.bf16.msra.mxu1 %v2874_v10  ;;  %v2118_v9 = vpop.f32.mrb[14].mxu0 }
 0x151   :  { %2392 = vmatprep.subr.bf16.mxu1 %v2872_v6  ;;  %326 = vst.msk [vmem:[#allocation2 + $0x78] sm:$0xff] %vm310_vm2, %v2118_v9  ;;  %v301_v11 = vpop.f32.mrb[15].mxu0 }
 0x152   :  { %325 = vst.msk [vmem:[#allocation2 + $0x70] sm:$0xff] %vm310_vm2, %v301_v11 }
 0x154   :  { %v1496_v4 = vld [vmem:[#allocation2 + $0x68] sm:$0xff] }
 0x155   :  { %v1495_v9 = vld [vmem:[#allocation2 + $0x60] sm:$0xff] }
 0x216   :  { %v2144_v50 = vpop.f32.mrb[2].mxu1 }
 0x217   :  { %v2946_v51 = vadd.f32 %v2144_v50, %v2943_v49  ;;  %v513_v52 = vpop.f32.mrb[3].mxu1 }
 0x218   :  { %v2950_v53 = vadd.f32 %v2943_v49, %v513_v52 }
 0x219   :  { %524 = vmax.xlane.f32.xlu0 %v2946_v51 }
 0x21d   :  { %522 = vmax.xlane.f32.xlu0 %v2950_v53 }
 0x21e   :  { %v2155_v56 = vpop.f32.mrb[4].mxu1 }
 0x21f   :  { %v627_v57 = vadd.f32 %v2155_v56, %v546_v54  ;;  %v617_v58 = vpop.f32.mrb[5].mxu1  ;;  %v1306_v56 = vld [vmem:[#allocation2 + $0x58] sm:$0xff] }
 0x220   :  { %v626_v59 = vadd.f32 %v617_v58, %v545_v55 }
 0x221   :  { %v629_v61 = vadd.f32 %v2916_v35, %v627_v57 }
 0x222   :  { %v628_v60 = vadd.f32 %v2916_v35, %v626_v59 }
 0x224   :  { %2168 = vmatprep.mubr.msk.f32.mxu0 %vm310_vm2, %v628_v60  ;;  %2179 = vmatprep.mubr.msk.f32.mxu1 %vm343_vm1, %v628_v60 }
 0x225   :  { %2169 = vmatmul.mubr.msk.f32.vlgmr.msra.gmra.mrb[16].mxu0 %vm310_vm2, %v629_v61  ;;  %2180 = vmatmul.mubr.msk.f32.vlgmr.msra.gmra.mrb[6].mxu1 %vm343_vm1, %v629_v61  ;;  %v1305_v61 = vld [vmem:[#allocation2 + $0x50] sm:$0xff] }
 0x226   :  { %2382 = vmatpush3.bf16.msra.mxu0 %v2883_v15  ;;  %2394 = vmatpush3.bf16.msra.mxu1 %v2872_v6 }
 0x227   :  { %2384 = vmatprep.subr.bf16.mxu0 %v2888_v18  ;;  %2396 = vmatprep.subr.bf16.mxu1 %v2874_v10 }
 0x22a   :  { %2386 = vmatpush3.bf16.msra.mxu0 %v2888_v18  ;;  %2398 = vmatpush3.bf16.msra.mxu1 %v2874_v10 }
 0x22b   :  { %2388 = vmatprep.subr.bf16.mxu0 %v2895_v21  ;;  %2400 = vmatprep.subr.bf16.mxu1 %v2883_v15 }
 0x22e   :  { %2390 = vmatpush3.bf16.msra.mxu0 %v2895_v21 }
 0x22f   :  { %2412 = vmatprep.subr.bf16.mxu0 %v2872_v6 }
 0x2f8   :  { %v2170_v14 = vpop.f32.mrb[16].mxu0  ;;  %v2181_v16 = vpop.f32.mrb[6].mxu1 }
 0x2f9   :  { %v2982_v17 = vadd.f32 %v2170_v14, %v2943_v49  ;;  %v817_v19 = vadd.f32 %v2181_v16, %v736_v12  ;;  %v702_v20 = vpop.f32.mrb[17].mxu0  ;;  %v807_v22 = vpop.f32.mrb[7].mxu1 }
 0x2fa   :  { %v816_v23 = vadd.f32 %v807_v22, %v735_v13  ;;  %v2988_v26 = vadd.f32 %v2943_v49, %v702_v20 }
 0x2fb   :  { %713 = vmax.xlane.f32.xlu1 %v2982_v17  ;;  %v819_v25 = vadd.f32 %v2916_v35, %v817_v19  ;;  %v1686_v19 = vld [vmem:[#allocation2 + $0x78] sm:$0xff] }
 0x2fc   :  { %v818_v24 = vadd.f32 %v2916_v35, %v816_v23 }
 0x2fe   :  { %2194 = vmatprep.mubr.msk.f32.mxu0 %vm310_vm2, %v818_v24  ;;  %2205 = vmatprep.mubr.msk.f32.mxu1 %vm343_vm1, %v818_v24 }
 0x2ff   :  { %2195 = vmatmul.mubr.msk.f32.vlgmr.msra.gmra.mrb[18].mxu0 %vm310_vm2, %v819_v25  ;;  %2206 = vmatmul.mubr.msk.f32.vlgmr.msra.gmra.mrb[8].mxu1 %vm343_vm1, %v819_v25  ;;  %v1685_v25 = vld [vmem:[#allocation2 + $0x70] sm:$0xff] }
 0x300   :  { %711 = vmax.xlane.f32.xlu1 %v2988_v26  ;;  %2402 = vmatpush3.bf16.msra.mxu1 %v2883_v15 }
 0x301   :  { %2404 = vmatprep.subr.bf16.mxu1 %v2888_v18  ;;  %2414 = vmatpush3.bf16.msra.mxu0 %v2872_v6 }
 0x302   :  { %2416 = vmatprep.subr.bf16.mxu0 %v2874_v10 }
 0x304   :  { %2406 = vmatpush3.bf16.msra.mxu1 %v2888_v18 }
 0x305   :  { %2408 = vmatprep.subr.bf16.mxu1 %v2895_v21  ;;  %2418 = vmatpush3.bf16.msra.mxu0 %v2874_v10 }
 0x306   :  { %2420 = vmatprep.subr.bf16.mxu0 %v2883_v15 }
 0x308   :  { %2410 = vmatpush3.bf16.msra.mxu1 %v2895_v21 }
 0x309   :  { %2432 = vmatprep.subr.bf16.mxu1 %v2872_v6 }
 0x3d2   :  { %v2196_v29 = vpop.f32.mrb[18].mxu0  ;;  %v2207_v30 = vpop.f32.mrb[8].mxu1 }
 0x3d3   :  { %v3006_v31 = vadd.f32 %v2196_v29, %v2943_v49  ;;  %v1007_v32 = vadd.f32 %v2207_v30, %v926_v27  ;;  %v892_v33 = vpop.f32.mrb[19].mxu0  ;;  %v997_v34 = vpop.f32.mrb[9].mxu1 }
 0x3d4   :  { %v3009_v36 = vadd.f32 %v2943_v49, %v892_v33  ;;  %v1006_v37 = vadd.f32 %v997_v34, %v925_v28  ;;  %v525_v29 = vpop.xlane.xlu0 %524  ;;  %v714_v30 = vpop.xlane.xlu1 %713 }
 0x3d5   :  { %903 = vmax.xlane.f32.xlu1 %v3006_v31  ;;  %v1009_v39 = vadd.f32 %v2916_v35, %v1007_v32  ;;  %v3110_v33 = vsub.f32 %v2946_v51, %v525_v29 }
 0x3d6   :  { %v1008_v38 = vadd.f32 %v2916_v35, %v1006_v37  ;;  %901 = vmax.xlane.f32.xlu0 %v3009_v36 }
 0x3d7   :  { %v530_v37 = vmul.f32 1.442695, %v3110_v33 }
 0x3d8   :  { %2220 = vmatprep.mubr.msk.f32.mxu1 %vm310_vm2, %v1008_v38  ;;  %2231 = vmatprep.mubr.msk.f32.mxu0 %vm343_vm1, %v1008_v38  ;;  %v523_v32 = vpop.xlane.xlu0 %522  ;;  %v3117_v38 = vsub.f32 %v2982_v17, %v714_v30 }
 0x3d9   :  { %2221 = vmatmul.mubr.msk.f32.vlgmr.msra.gmra.mrb[10].mxu1 %vm310_vm2, %v1009_v39  ;;  %2232 = vmatmul.mubr.msk.f32.vlgmr.msra.gmra.mrb[20].mxu0 %vm343_vm1, %v1009_v39  ;;  %v3113_v34 = vsub.f32 %v2950_v53, %v523_v32  ;;  %2500 = vpow2.f32 %v530_v37 }
 0x3da   :  { %2422 = vmatpush3.bf16.msra.mxu0 %v2883_v15  ;;  %2434 = vmatpush3.bf16.msra.mxu1 %v2872_v6  ;;  %v719_v51 = vmul.f32 1.442695, %v3117_v38 }
 0x3db   :  { %2424 = vmatprep.subr.bf16.mxu0 %v2888_v18  ;;  %2436 = vmatprep.subr.bf16.mxu1 %v2874_v10  ;;  %v528_v39 = vmul.f32 1.442695, %v3113_v34 }
 0x3dd   :  { %2502 = vpow2.f32 %v528_v39 }
 0x3de   :  { %2426 = vmatpush3.bf16.msra.mxu0 %v2888_v18  ;;  %2438 = vmatpush3.bf16.msra.mxu1 %v2874_v10  ;;  %2504 = vpow2.f32 %v719_v51 }
 0x3df   :  { %2428 = vmatprep.subr.bf16.mxu0 %v2895_v21  ;;  %2440 = vmatprep.subr.bf16.mxu1 %v2883_v15 }
 0x3e2   :  { %2430 = vmatpush3.bf16.msra.mxu0 %v2895_v21 }
 0x3e3   :  { %2452 = vmatprep.subr.bf16.mxu0 %v2872_v6 }
 0x4ac   :  { %v2222_v40 = vpop.f32.mrb[10].mxu1  ;;  %v2233_v42 = vpop.f32.mrb[20].mxu0 }
 0x4ad   :  { %v3030_v43 = vadd.f32 %v2222_v40, %v2943_v49  ;;  %v1197_v44 = vadd.f32 %v2233_v42, %v1116_v41  ;;  %v1082_v45 = vpop.f32.mrb[11].mxu1  ;;  %v1187_v47 = vpop.f32.mrb[21].mxu0 }
 0x4ae   :  { %v3033_v48 = vadd.f32 %v2943_v49, %v1082_v45  ;;  %v1196_v50 = vadd.f32 %v1187_v47, %v1115_v46  ;;  %v902_v42 = vpop.xlane.xlu0 %901 }
 0x4af   :  { %1093 = vmax.xlane.f32.xlu1 %v3030_v43  ;;  %v1199_v54 = vadd.f32 %v2916_v35, %v1197_v44  ;;  %v3129_v45 = vsub.f32 %v3009_v36, %v902_v42 }
 0x4b0   :  { %v1198_v52 = vadd.f32 %v2916_v35, %v1196_v50  ;;  %1091 = vmax.xlane.f32.xlu0 %v3033_v48 }
 0x4b2   :  { %2246 = vmatprep.mubr.msk.f32.mxu0 %vm310_vm2, %v1198_v52  ;;  %2257 = vmatprep.mubr.msk.f32.mxu1 %vm343_vm1, %v1198_v52  ;;  %v907_v52 = vmul.f32 1.442695, %v3129_v45 }
 0x4b3   :  { %2247 = vmatmul.mubr.msk.f32.vlgmr.msra.gmra.mrb[22].mxu0 %vm310_vm2, %v1199_v54  ;;  %2258 = vmatmul.mubr.msk.f32.vlgmr.msra.gmra.mrb[12].mxu1 %vm343_vm1, %v1199_v54 }
 0x4b4   :  { %2442 = vmatpush3.bf16.msra.mxu1 %v2883_v15  ;;  %2454 = vmatpush3.bf16.msra.mxu0 %v2872_v6 }
 0x4b5   :  { %2444 = vmatprep.subr.bf16.mxu1 %v2888_v18  ;;  %2456 = vmatprep.subr.bf16.mxu0 %v2874_v10 }
 0x4b8   :  { %2446 = vmatpush3.bf16.msra.mxu1 %v2888_v18  ;;  %2458 = vmatpush3.bf16.msra.mxu0 %v2874_v10 }
 0x4b9   :  { %2448 = vmatprep.subr.bf16.mxu1 %v2895_v21  ;;  %2460 = vmatprep.subr.bf16.mxu0 %v2883_v15 }
 0x4bc   :  { %2450 = vmatpush3.bf16.msra.mxu1 %v2895_v21 }
 0x4bd   :  { %2472 = vmatprep.subr.bf16.mxu1 %v2872_v6 }
 0x53d   :  { %v1092_v46 = vpop.xlane.xlu0 %1091 }
 0x586   :  { %v2248_v55 = vpop.f32.mrb[22].mxu0  ;;  %v2259_v57 = vpop.f32.mrb[12].mxu1 }
 0x587   :  { %v3054_v58 = vadd.f32 %v2248_v55, %v2943_v49  ;;  %v1387_v59 = vadd.f32 %v2259_v57, %v1306_v56  ;;  %v1272_v60 = vpop.f32.mrb[23].mxu0  ;;  %v1377_v62 = vpop.f32.mrb[13].mxu1 }
 0x588   :  { %v3057_v63 = vadd.f32 %v2943_v49, %v1272_v60  ;;  %v1386_v0 = vadd.f32 %v1377_v62, %v1305_v61  ;;  %v2501_v62 = vpop.eup %2500 }
 0x589   :  { %1283 = vmax.xlane.f32.xlu1 %v3054_v58  ;;  %v1389_v2 = vadd.f32 %v2916_v35, %v1387_v59 }
 0x58a   :  { %v1388_v1 = vadd.f32 %v2916_v35, %v1386_v0  ;;  %1281 = vmax.xlane.f32.xlu0 %v3057_v63 }
 0x58c   :  { %2272 = vmatprep.mubr.msk.f32.mxu1 %vm310_vm2, %v1388_v1  ;;  %2283 = vmatprep.mubr.msk.f32.mxu0 %vm343_vm1, %v1388_v1  ;;  %v2503_v1 = vpop.eup %2502 }
 0x58d   :  { %2273 = vmatmul.mubr.msk.f32.vlgmr.msra.gmra.mrb[14].mxu1 %vm310_vm2, %v1389_v2  ;;  %2284 = vmatmul.mubr.msk.f32.vlgmr.msra.gmra.mrb[24].mxu0 %vm343_vm1, %v1389_v2 }
 0x58e   :  { %2462 = vmatpush3.bf16.msra.mxu0 %v2883_v15  ;;  %2474 = vmatpush3.bf16.msra.mxu1 %v2872_v6 }
 0x58f   :  { %2464 = vmatprep.subr.bf16.mxu0 %v2888_v18  ;;  %2476 = vmatprep.subr.bf16.mxu1 %v2874_v10 }
 0x592   :  { %2466 = vmatpush3.bf16.msra.mxu0 %v2888_v18  ;;  %2478 = vmatpush3.bf16.msra.mxu1 %v2874_v10 }
 0x593   :  { %2468 = vmatprep.subr.bf16.mxu0 %v2895_v21  ;;  %2480 = vmatprep.subr.bf16.mxu1 %v2883_v15 }
 0x596   :  { %2470 = vmatpush3.bf16.msra.mxu0 %v2895_v21 }
 0x617   :  { %v1282_v56 = vpop.xlane.xlu0 %1281 }
 0x618   :  { %v3150_v60 = vsub.f32 %v3057_v63, %v1282_v56 }
 0x660   :  { %v2274_v3 = vpop.f32.mrb[14].mxu1  ;;  %v2285_v5 = vpop.f32.mrb[24].mxu0 }
 0x661   :  { %v3077_v7 = vadd.f32 %v2274_v3, %v2943_v49  ;;  %v1577_v6 = vadd.f32 %v2285_v5, %v1496_v4  ;;  %v1462_v8 = vpop.f32.mrb[15].mxu1  ;;  %v1567_v11 = vpop.f32.mrb[25].mxu0 }
 0x662   :  { %v3080_v12 = vadd.f32 %v2943_v49, %v1462_v8  ;;  %v1576_v10 = vadd.f32 %v1567_v11, %v1495_v9  ;;  %v2505_v4 = vpop.eup %2504 }
 0x663   :  { %1473 = vmax.xlane.f32.xlu1 %v3077_v7  ;;  %v1579_v14 = vadd.f32 %v2916_v35, %v1577_v6 }
 0x664   :  { %v1578_v13 = vadd.f32 %v2916_v35, %v1576_v10  ;;  %1471 = vmax.xlane.f32.xlu0 %v3080_v12 }
 0x666   :  { %2298 = vmatprep.mubr.msk.f32.mxu0 %vm310_vm2, %v1578_v13  ;;  %2309 = vmatprep.mubr.msk.f32.mxu1 %vm343_vm1, %v1578_v13 }
 0x667   :  { %2299 = vmatmul.mubr.msk.f32.vlgmr.msra.gmra.mrb[26].mxu0 %vm310_vm2, %v1579_v14  ;;  %2310 = vmatmul.mubr.msk.f32.vlgmr.msra.gmra.mrb[16].mxu1 %vm343_vm1, %v1579_v14 }
 0x668   :  { %2482 = vmatpush3.bf16.msra.mxu1 %v2883_v15 }
 0x669   :  { %2484 = vmatprep.subr.bf16.mxu1 %v2888_v18 }
 0x66c   :  { %2486 = vmatpush3.bf16.msra.mxu1 %v2888_v18 }
 0x66d   :  { %2488 = vmatprep.subr.bf16.mxu1 %v2895_v21 }
 0x670   :  { %2490 = vmatpush3.bf16.msra.mxu1 %v2895_v21 }
 0x6f1   :  { %v1472_v0 = vpop.xlane.xlu0 %1471 }
 0x6f2   :  { %v3158_v3 = vsub.f32 %v3080_v12, %v1472_v0 }
 0x73a   :  { %v2300_v16 = vpop.f32.mrb[26].mxu0  ;;  %v2311_v20 = vpop.f32.mrb[16].mxu1 }
 0x73b   :  { %v3096_v22 = vadd.f32 %v2300_v16, %v2943_v49  ;;  %v1767_v23 = vadd.f32 %v2311_v20, %v1686_v19  ;;  %v1652_v24 = vpop.f32.mrb[27].mxu0  ;;  %v1757_v27 = vpop.f32.mrb[17].mxu1 }
 0x73c   :  { %v3099_v15 = vadd.f32 %v2943_v49, %v1652_v24  ;;  %v1766_v28 = vadd.f32 %v1757_v27, %v1685_v25 }
 0x73d   :  { %v1769_v18 = vadd.f32 %v2916_v35, %v1767_v23  ;;  %1663 = vmax.xlane.f32.xlu1 %v3096_v22 }
 0x73e   :  { %v1768_v21 = vadd.f32 %v2916_v35, %v1766_v28  ;;  %1661 = vmax.xlane.f32.xlu0 %v3099_v15  ;;  %v712_v35 = vpop.xlane.xlu1 %711 }
 0x73f   :  { %1875 = vst.msk [vmem:[#allocation13 + $0x8] sm:$0xff] %vm343_vm1, %v1769_v18  ;;  %v3121_v40 = vsub.f32 %v2988_v26, %v712_v35 }
 0x740   :  { %1874 = vst.msk [vmem:[#allocation13] sm:$0xff] %vm343_vm1, %v1768_v21  ;;  %2324 = vmatprep.mubr.msk.f32.mxu1 %vm310_vm2, %v1768_v21 }
 0x741   :  { %2325 = vmatmul.mubr.msk.f32.vlgmr.msra.gmra.mrb[18].mxu1 %vm310_vm2, %v1769_v18  ;;  %v717_v53 = vmul.f32 1.442695, %v3121_v40 }
 0x742   :  { %v904_v41 = vpop.xlane.xlu1 %903 }
 0x743   :  { %v3125_v44 = vsub.f32 %v3006_v31, %v904_v41  ;;  %2506 = vpow2.f32 %v717_v53  ;;  %v3137_v31 = vsub.f32 %v3033_v48, %v1092_v46 }
 0x745   :  { %v909_v26 = vmul.f32 1.442695, %v3125_v44  ;;  %v1097_v48 = vmul.f32 1.442695, %v3137_v31 }
 0x746   :  { %v1094_v17 = vpop.xlane.xlu1 %1093 }
 0x747   :  { %v3133_v47 = vsub.f32 %v3030_v43, %v1094_v17  ;;  %2508 = vpow2.f32 %v909_v26 }
 0x748   :  { %2510 = vpow2.f32 %v907_v52 }
 0x749   :  { %v1099_v43 = vmul.f32 1.442695, %v3133_v47 }
 0x74a   :  { %v1284_v54 = vpop.xlane.xlu1 %1283 }
 0x74b   :  { %v3146_v59 = vsub.f32 %v3054_v58, %v1284_v54  ;;  %2512 = vpow2.f32 %v1099_v43  ;;  %v1287_v58 = vmul.f32 1.442695, %v3150_v60 }
 0x74c   :  { %2514 = vpow2.f32 %v1097_v48 }
 0x74d   :  { %v2507_v6 = vpop.eup %2506 }
 0x74e   :  { %v1474_v61 = vpop.xlane.xlu1 %1473 }
 0x74f   :  { %v3154_v2 = vsub.f32 %v3077_v7, %v1474_v61  ;;  %v1477_v7 = vmul.f32 1.442695, %v3158_v3 }
 0x751   :  { %v1479_v8 = vmul.f32 1.442695, %v3154_v2  ;;  %v2509_v12 = vpop.eup %2508 }
 0x752   :  { %v2511_v10 = vpop.eup %2510 }
 0x755   :  { %v2513_v16 = vpop.eup %2512 }
 0x756   :  { %v2515_v19 = vpop.eup %2514 }
 0x7ca   :  { %v1664_v63 = vpop.xlane.xlu1 %1663 }
 0x7cb   :  { %v1662_v5 = vpop.xlane.xlu0 %1661  ;;  %v3162_v9 = vsub.f32 %v3096_v22, %v1664_v63 }
 0x7cc   :  { %v3166_v11 = vsub.f32 %v3099_v15, %v1662_v5 }
 0x7cd   :  { %v1669_v13 = vmul.f32 1.442695, %v3162_v9 }
 0x7ce   :  { %v1667_v14 = vmul.f32 1.442695, %v3166_v11 }
 0x814   :  { %v2326_v50 = vpop.f32.mrb[18].mxu1 }
 0x815   :  { %v3140_v55 = vadd.f32 %v2326_v50, %v2943_v49  ;;  %v1842_v36 = vpop.f32.mrb[19].mxu1 }
 0x816   :  { %v1843_v57 = vadd.f32 %v2943_v49, %v1842_v36  ;;  %v1289_v49 = vmul.f32 1.442695, %v3146_v59 }
 0x817   :  { %1853 = vmax.xlane.f32.xlu1 %v3140_v55 }
 0x818   :  { %1851 = vmax.xlane.f32.xlu0 %v1843_v57  ;;  %2516 = vpow2.f32 %v1289_v49 }
 0x819   :  { %2518 = vpow2.f32 %v1287_v58 }
 0x81a   :  { %2520 = vpow2.f32 %v1479_v8 }
 0x81b   :  { %534 = vadd.xlane.f32.xlu1 %v2501_v62  ;;  %2522 = vpow2.f32 %v1477_v7 }
 0x81c   :  { %532 = vadd.xlane.f32.xlu0 %v2503_v1  ;;  %2524 = vpow2.f32 %v1669_v13 }
 0x81d   :  { %2526 = vpow2.f32 %v1667_v14 }
 0x81f   :  { %723 = vadd.xlane.f32.xlu1 %v2505_v4 }
 0x820   :  { %721 = vadd.xlane.f32.xlu0 %v2507_v6 }
 0x822   :  { %v2517_v20 = vpop.eup %2516 }
 0x823   :  { %913 = vadd.xlane.f32.xlu1 %v2509_v12  ;;  %v2519_v22 = vpop.eup %2518 }
 0x824   :  { %911 = vadd.xlane.f32.xlu0 %v2511_v10  ;;  %v2521_v23 = vpop.eup %2520 }
 0x825   :  { %v2523_v24 = vpop.eup %2522 }
 0x826   :  { %v2525_v25 = vpop.eup %2524 }
 0x827   :  { %1103 = vadd.xlane.f32.xlu1 %v2513_v16  ;;  %v2527_v27 = vpop.eup %2526 }
 0x828   :  { %1101 = vadd.xlane.f32.xlu0 %v2515_v19 }
 0x82b   :  { %1293 = vadd.xlane.f32.xlu1 %v2517_v20 }
 0x82c   :  { %1291 = vadd.xlane.f32.xlu0 %v2519_v22 }
 0x82f   :  { %1483 = vadd.xlane.f32.xlu1 %v2521_v23 }
 0x830   :  { %1481 = vadd.xlane.f32.xlu0 %v2523_v24 }
 0x833   :  { %1673 = vadd.xlane.f32.xlu1 %v2525_v25 }
 0x834   :  { %1671 = vadd.xlane.f32.xlu0 %v2527_v27 }
 0x8a4   :  { %v1854_v15 = vpop.xlane.xlu1 %1853 }
 0x8a5   :  { %v3171_v28 = vsub.f32 %v3140_v55, %v1854_v15  ;;  %v1852_v18 = vpop.xlane.xlu0 %1851 }
 0x8a6   :  { %v3173_v21 = vsub.f32 %v1843_v57, %v1852_v18 }
 0x8a7   :  { %v1859_v29 = vmul.f32 1.442695, %v3171_v28 }
 0x8a8   :  { %v1857_v30 = vmul.f32 1.442695, %v3173_v21  ;;  %v535_v32 = vpop.xlane.xlu1 %534 }
 0x8a9   :  { %2528 = vpow2.f32 %v1859_v29  ;;  %v533_v35 = vpop.xlane.xlu0 %532 }
 0x8aa   :  { %2530 = vpow2.f32 %v1857_v30 }
 0x8ab   :  { %2532 = vlog2.f32 %v535_v32 }
 0x8ac   :  { %2534 = vlog2.f32 %v533_v35  ;;  %v724_v37 = vpop.xlane.xlu1 %723 }
 0x8ad   :  { %2536 = vlog2.f32 %v724_v37  ;;  %v722_v39 = vpop.xlane.xlu0 %721 }
 0x8ae   :  { %2538 = vlog2.f32 %v722_v39 }
 0x8b0   :  { %v914_v41 = vpop.xlane.xlu1 %913 }
 0x8b1   :  { %2540 = vlog2.f32 %v914_v41  ;;  %v912_v42 = vpop.xlane.xlu0 %911 }
 0x8b2   :  { %2542 = vlog2.f32 %v912_v42 }
 0x8b3   :  { %v2529_v51 = vpop.eup %2528 }
 0x8b4   :  { %v2531_v53 = vpop.eup %2530  ;;  %1863 = vadd.xlane.f32.xlu1 %v2529_v51  ;;  %v1104_v17 = vpop.xlane.xlu1 %1103 }
 0x8b5   :  { %v2533_v46 = vpop.eup %2532  ;;  %2544 = vlog2.f32 %v1104_v17  ;;  %1861 = vadd.xlane.f32.xlu0 %v2531_v53  ;;  %v1102_v26 = vpop.xlane.xlu0 %1101 }
 0x8b6   :  { %v2535_v50 = vpop.eup %2534  ;;  %v539_v52 = vmul.f32 0.6931472, %v2533_v46  ;;  %2546 = vlog2.f32 %v1102_v26 }
 0x8b7   :  { %v2537_v54 = vpop.eup %2536  ;;  %v537_v55 = vmul.f32 0.6931472, %v2535_v50 }
 0x8b8   :  { %v2539_v36 = vpop.eup %2538  ;;  %v541_v56 = vsub.f32 %v3110_v33, %v539_v52  ;;  %v728_v57 = vmul.f32 0.6931472, %v2537_v54  ;;  %v1294_v43 = vpop.xlane.xlu1 %1293 }
 0x8b9   :  { %v540_v48 = vsub.f32 %v3113_v34, %v537_v55  ;;  %v726_v61 = vmul.f32 0.6931472, %v2539_v36  ;;  %2548 = vlog2.f32 %v1294_v43  ;;  %v1292_v62 = vpop.xlane.xlu0 %1291 }
 0x8ba   :  { %543 = vst [vmem:[#allocation12 + $0x8] sm:$0xff] %v541_v56  ;;  %v730_v0 = vsub.f32 %v3117_v38, %v728_v57  ;;  %2550 = vlog2.f32 %v1292_v62 }
 0x8bb   :  { %v2541_v1 = vpop.eup %2540  ;;  %542 = vst [vmem:[#allocation12] sm:$0xff] %v540_v48  ;;  %v729_v49 = vsub.f32 %v3121_v40, %v726_v61 }
 0x8bc   :  { %v2543_v58 = vpop.eup %2542  ;;  %733 = vst [vmem:[#allocation12 + $0x18] sm:$0xff] %v730_v0  ;;  %v918_v63 = vmul.f32 0.6931472, %v2541_v1  ;;  %v1484_v4 = vpop.xlane.xlu1 %1483 }
 0x8bd   :  { %732 = vst [vmem:[#allocation12 + $0x10] sm:$0xff] %v729_v49  ;;  %v916_v33 = vmul.f32 0.6931472, %v2543_v58  ;;  %2552 = vlog2.f32 %v1484_v4  ;;  %v1482_v5 = vpop.xlane.xlu0 %1481 }
 0x8be   :  { %v920_v34 = vsub.f32 %v3125_v44, %v918_v63  ;;  %2554 = vlog2.f32 %v1482_v5 }
 0x8bf   :  { %v2545_v6 = vpop.eup %2544  ;;  %v919_v8 = vsub.f32 %v3129_v45, %v916_v33 }
 0x8c0   :  { %v2547_v38 = vpop.eup %2546  ;;  %923 = vst [vmem:[#allocation12 + $0x28] sm:$0xff] %v920_v34  ;;  %v1108_v7 = vmul.f32 0.6931472, %v2545_v6  ;;  %v1674_v12 = vpop.xlane.xlu1 %1673 }
 0x8c1   :  { %922 = vst [vmem:[#allocation12 + $0x20] sm:$0xff] %v919_v8  ;;  %v1106_v40 = vmul.f32 0.6931472, %v2547_v38  ;;  %2556 = vlog2.f32 %v1674_v12  ;;  %v1672_v10 = vpop.xlane.xlu0 %1671 }
 0x8c2   :  { %v1110_v13 = vsub.f32 %v3133_v47, %v1108_v7  ;;  %2558 = vlog2.f32 %v1672_v10 }
 0x8c3   :  { %v2549_v14 = vpop.eup %2548  ;;  %v1109_v16 = vsub.f32 %v3137_v31, %v1106_v40 }
 0x8c4   :  { %v2551_v19 = vpop.eup %2550  ;;  %1113 = vst [vmem:[#allocation12 + $0x38] sm:$0xff] %v1110_v13  ;;  %v1298_v44 = vmul.f32 0.6931472, %v2549_v14 }
 0x8c5   :  { %1112 = vst [vmem:[#allocation12 + $0x30] sm:$0xff] %v1109_v16  ;;  %v1296_v20 = vmul.f32 0.6931472, %v2551_v19 }
 0x8c6   :  { %v1300_v45 = vsub.f32 %v3146_v59, %v1298_v44 }
 0x8c7   :  { %v2553_v22 = vpop.eup %2552  ;;  %v1299_v23 = vsub.f32 %v3150_v60, %v1296_v20 }
 0x8c8   :  { %v2555_v24 = vpop.eup %2554  ;;  %1303 = vst [vmem:[#allocation12 + $0x48] sm:$0xff] %v1300_v45  ;;  %v1488_v25 = vmul.f32 0.6931472, %v2553_v22 }
 0x8c9   :  { %1302 = vst [vmem:[#allocation12 + $0x40] sm:$0xff] %v1299_v23  ;;  %v1486_v27 = vmul.f32 0.6931472, %v2555_v24 }
 0x8ca   :  { %v1490_v47 = vsub.f32 %v3154_v2, %v1488_v25 }
 0x8cb   :  { %v2557_v15 = vpop.eup %2556  ;;  %v1489_v31 = vsub.f32 %v3158_v3, %v1486_v27 }
 0x8cc   :  { %v2559_v18 = vpop.eup %2558  ;;  %1493 = vst [vmem:[#allocation12 + $0x58] sm:$0xff] %v1490_v47  ;;  %v1678_v29 = vmul.f32 0.6931472, %v2557_v15 }
 0x8cd   :  { %1492 = vst [vmem:[#allocation12 + $0x50] sm:$0xff] %v1489_v31  ;;  %v1676_v30 = vmul.f32 0.6931472, %v2559_v18 }
 0x8ce   :  { %v1680_v59 = vsub.f32 %v3162_v9, %v1678_v29 }
 0x8cf   :  { %v1679_v32 = vsub.f32 %v3166_v11, %v1676_v30 }
 0x8d0   :  { %1683 = vst [vmem:[#allocation12 + $0x68] sm:$0xff] %v1680_v59 }
 0x8d1   :  { %1682 = vst [vmem:[#allocation12 + $0x60] sm:$0xff] %v1679_v32 }
 0x8d2   :  { %2685 = shalt.err (!%p2682_p2)
}
 0x8d3   :  { %s2686_s27 = scalar_lea.hbm %s3231_s8, 256 }
 0x8d4   :  { %p2687_p3 = scmp.ne.s32.totalorder %s3231_s8, %s2686_s27  ;;  %p2690_p4 = scmp.lt.u32.totalorder %s2686_s27, %s3231_s8 }
 0x8d6   :  { %p2692_p5 = pnand %p2690_p4, %p2687_p3 }
 0x8d8   :  { %2695 = shalt.err (!%p2692_p5)
}
 0x8d9   :  { %1899 = dma.vmem_to_hbm [thread:$0]  %s1894_s23, 256, %s3231_s8, [#allocation14], %s2730_s17, %s2730_s17, %s2731_s18  }
 0x8da   :  { %s2736_s11 = smov [#allocation12]  }
 0x8db   :  { %s1881_s13 = sshll.u32 %s2736_s11, 4  ;;  %s1882_s13 = int_to_ptr.vmem [resolvable:$true] %s1881_s13 }
 0x8dc   :  { %s2696_s14 = scalar_lea.vmem %s1882_s13, 2048  ;;  %p2701_p7 = scmp.lt.s32.totalorder %s1882_s13, %s1882_s13 }
 0x8dd   :  { %p2697_p6 = scmp.ne.s32.totalorder %s1882_s13, %s2696_s14  ;;  %p2702_p8 = scmp.lt.s32.totalorder %s2696_s14, %s2696_s14 }
 0x8df   :  { %p2703_p9 = por %p2702_p8, %p2701_p7 }
 0x8e1   :  { %p2704_p10 = pnand %p2703_p9, %p2697_p6 }
 0x941   :  { %v1864_v60 = vpop.xlane.xlu1 %1863 }
 0x942   :  { %2560 = vlog2.f32 %v1864_v60  ;;  %v1862_v2 = vpop.xlane.xlu0 %1861 }
 0x943   :  { %2562 = vlog2.f32 %v1862_v2 }
 0x94c   :  { %v2561_v3 = vpop.eup %2560 }
 0x94d   :  { %v2563_v9 = vpop.eup %2562  ;;  %v1868_v11 = vmul.f32 0.6931472, %v2561_v3 }
 0x94e   :  { %v1866_v35 = vmul.f32 0.6931472, %v2563_v9 }
 0x94f   :  { %v1870_v37 = vsub.f32 %v3171_v28, %v1868_v11 }
 0x950   :  { %v1869_v39 = vsub.f32 %v3173_v21, %v1866_v35 }
 0x951   :  { %1873 = vst [vmem:[#allocation12 + $0x78] sm:$0xff] %v1870_v37 }
 0x952   :  { %1872 = vst [vmem:[#allocation12 + $0x70] sm:$0xff] %v1869_v39 }
 0x953   :  { %2707 = shalt.err (!%p2704_p10)
}
 0x954   :  { %s2708_s16 = scalar_lea.hbm %s3230_s7, 2048 }
 0x955   :  { %p2709_p11 = scmp.ne.s32.totalorder %s3230_s7, %s2708_s16  ;;  %p2712_p12 = scmp.lt.u32.totalorder %s2708_s16, %s3230_s7 }
 0x957   :  { %p2714_p13 = pnand %p2712_p12, %p2709_p11 }
 0x959   :  { %2717 = shalt.err (!%p2714_p13)
}
 0x95a   :  { %1887 = dma.vmem_to_hbm [thread:$0]  %s1882_s13, 2048, %s3230_s7, [#allocation5], %s2730_s17, %s2730_s17, %s2731_s18  }
 0x95b   :  { %2724 = dma.done.wait [#allocation5], 2048  }
 0x95c   :  { %2725 = vsyncadd [#allocation5], 4294965248 }
 0x95d   :  { %2726 = dma.done.wait [#allocation14], 256  }
 0x95e   :  { %2727 = vsyncadd [#allocation14], 4294967040 }
 0x95f   :  { %1906 = vsyncpa [#allocation4], 1 }
 0x960   :  { %1907 = vsyncpa [#allocation7], 1 }
 0x961   :  { %1908 = vsyncpa [#allocation10], 1 }
 0x962   :  { %1909 = vsyncpa [#allocation5], 1 }
 0x963   :  { %1910 = vsyncpa [#allocation14], 1 }

</bundles_post_ra>
